<compile_context>
chip_gen: v7x
topology: tpu7x:2x2x1
jax: 0.10.0
libtpu: 0.0.40
codegen_flags: <defaults>
</compile_context>

<pallas_src>
import functools

import jax
import jax.numpy as jnp
from jax.experimental import pallas as pl
from jax.experimental.pallas import tpu as pltpu


# --------------------- Kernel 1: RNN + per-tile logit max -------------------
def rnn_attn_kernel(ed_ref, wih_ref, whh_ref, b_ref, attn_ref,
                    eft_ref, amax_ref, *, seq_len, hidden, alpha, n_valid,
                    tile_e, compute_dtype):
    # ed_ref:   (TE, L*D)      gathered metapath features (bf16 or f32)
    # wih_ref:  (L*D, L*H)     block-diag repeated input->hidden weight
    # whh_ref:  (H, H)         hidden->hidden weight
    # b_ref:    (1, H) f32     combined bias
    # attn_ref: (H, H)         block attention matrix (broadcasts per-head dot)
    # eft_ref:  (TE, H)        final hidden state (output)
    # amax_ref: (1, 1, H) f32  per-tile masked logit max (output)
    cdt = compute_dtype
    H = hidden
    half = tile_e // 2

    ed = ed_ref[...].astype(cdt)
    wih = wih_ref[...]
    whh = whh_ref[...]
    attn_m = attn_ref[...]
    b = b_ref[...]

    # Single K=L*D input projection (replaces L separate K=D matmuls).
    proj = jnp.dot(ed, wih, preferred_element_type=jnp.float32)   # (TE, L*H)

    def recur(p):  # p: (half, L*H) f32 -> (half, H) f32
        # t = 0: hidden state starts at zero -> skip h @ W_hh.
        h = jnp.tanh(p[:, :H] + b)
        for t in range(1, seq_len):
            hz = jnp.dot(h.astype(cdt), whh, preferred_element_type=jnp.float32)
            h = jnp.tanh(p[:, t * H:(t + 1) * H] + hz + b)
        return h

    # Two independent half-tiles: the scheduler can overlap one chain's MXU
    # step with the other's tanh (EUP) step.
    ha = recur(proj[:half])
    hb = recur(proj[half:])

    eft_ref[pl.ds(0, half), :] = ha.astype(cdt)
    eft_ref[pl.ds(half, half), :] = hb.astype(cdt)

    # Per-tile attention-logit max (softmax shift), masked to valid edges so
    # padded rows never contaminate the global max.
    base = pl.program_id(0) * tile_e

    def logit_max(h, row0):
        a = jnp.dot(h.astype(cdt), attn_m, preferred_element_type=jnp.float32)
        a = jnp.where(a > 0, a, alpha * a)                       # LeakyReLU
        rows = row0 + jax.lax.broadcasted_iota(jnp.int32, a.shape, 0)
        a = jnp.where(rows < n_valid, a, -1e30)
        return jnp.max(a, axis=0, keepdims=True)                 # (1, H)

    m = jnp.maximum(logit_max(ha, base), logit_max(hb, base + half))
    amax_ref[...] = m[None]                                      # (1, 1, H)


def run_rnn_attn(edata_flat, wih_block, w_hh, b, attn_mat, *, seq_len, hidden,
                 alpha, n_valid, tile_e, compute_dtype):
    E_pad, LD = edata_flat.shape
    LH = wih_block.shape[1]
    H = hidden
    n_tiles = E_pad // tile_e
    kern = functools.partial(rnn_attn_kernel, seq_len=seq_len, hidden=H,
                             alpha=alpha, n_valid=n_valid, tile_e=tile_e,
                             compute_dtype=compute_dtype)
    return pl.pallas_call(
        kern,
        out_shape=(jax.ShapeDtypeStruct((E_pad, H), compute_dtype),
                   jax.ShapeDtypeStruct((n_tiles, 1, H), jnp.float32)),
        grid_spec=pltpu.PrefetchScalarGridSpec(
            num_scalar_prefetch=0,
            grid=(n_tiles,),
            in_specs=[
                pl.BlockSpec((tile_e, LD), lambda i: (i, 0)),
                pl.BlockSpec((LD, LH), lambda i: (0, 0)),
                pl.BlockSpec((H, H), lambda i: (0, 0)),
                pl.BlockSpec((1, H), lambda i: (0, 0)),
                pl.BlockSpec((H, H), lambda i: (0, 0)),
            ],
            out_specs=[
                pl.BlockSpec((tile_e, H), lambda i: (i, 0)),
                pl.BlockSpec((1, 1, H), lambda i: (i, 0, 0)),
            ],
        ),
        compiler_params=pltpu.CompilerParams(
            dimension_semantics=("parallel",),
            vmem_limit_bytes=32 * 1024 * 1024,
        ),
    )(edata_flat, wih_block, w_hh, b, attn_mat)


# ------------ Kernel 2: edge-softmax + aggregation (E-tiled reduce) ----------
def attn_agg_kernel(amax_ref, dst_ref, eft_ref, attn_ref, out_ref, acc_ref, *,
                    alpha, tile_n, hidden, compute_dtype):
    # amax_ref: (1,) f32 in SMEM  global masked logit max
    # dst_ref:  (1, TE) int32     edge destination node ids (padded: -1)
    # eft_ref:  (TE, H)           edge hidden states
    # attn_ref: (H, H)            block attention matrix
    # out_ref:  (TN, H) f32       aggregated node features
    # acc_ref:  (TN, 2H) f32      fused [numerator | denominator] accumulator
    cdt = compute_dtype
    H = hidden
    k = pl.program_id(1)

    @pl.when(k == 0)
    def _():
        acc_ref[...] = jnp.zeros_like(acc_ref)

    eft = eft_ref[...]
    # Recompute the broadcast attention logits from eft (no (E, H) elog stream).
    a = jnp.dot(eft.astype(cdt), attn_ref[...],
                preferred_element_type=jnp.float32)
    a = jnp.where(a > 0, a, alpha * a)                           # LeakyReLU
    p = jnp.exp(a - amax_ref[0])                                 # (TE, H), f32
    # TODO(synk): attn_drop (Dropout 0.5) is identity in eval mode.

    # dst one-hot built on the fly (no dense (N, E) matrix in HBM). Padded
    # edges have dst = -1 and never match a node row.
    tile_e = dst_ref.shape[1]
    node = pl.program_id(0) * tile_n + jax.lax.broadcasted_iota(
        jnp.int32, (tile_n, tile_e), 0)
    onehot = jnp.where(node == dst_ref[...], 1.0, 0.0).astype(cdt)  # (TN, TE)

    # Fused numerator/denominator: one N=2H matmul filling the 256-wide MXU.
    wv = jnp.concatenate([eft.astype(jnp.float32) * p, p], axis=1).astype(cdt)
    acc_ref[...] += jnp.dot(onehot, wv, preferred_element_type=jnp.float32)

    @pl.when(k == pl.num_programs(1) - 1)
    def _():
        num = acc_ref[:, :H]
        den = acc_ref[:, H:]
        # isolated / padded nodes have denom == 0 -> output 0 (matches ref).
        out_ref[...] = num / jnp.where(den > 0.0, den, 1.0)


def run_attn_agg(amax, dst, eft, attn_mat, *, alpha, tile_n, tile_e, n_pad,
                 hidden, compute_dtype):
    E_pad = eft.shape[0]
    H = hidden
    kern = functools.partial(attn_agg_kernel, alpha=alpha, tile_n=tile_n,
                             hidden=H, compute_dtype=compute_dtype)
    return pl.pallas_call(
        kern,
        out_shape=jax.ShapeDtypeStruct((n_pad, H), jnp.float32),
        grid_spec=pltpu.PrefetchScalarGridSpec(
            num_scalar_prefetch=0,
            grid=(n_pad // tile_n, E_pad // tile_e),
            in_specs=[
                pl.BlockSpec(memory_space=pltpu.MemorySpace.SMEM),
                pl.BlockSpec((1, tile_e), lambda i, k: (0, k)),
                pl.BlockSpec((tile_e, H), lambda i, k: (k, 0)),
                pl.BlockSpec((H, H), lambda i, k: (0, 0)),
            ],
            out_specs=pl.BlockSpec((tile_n, H), lambda i, k: (i, 0)),
            scratch_shapes=[pltpu.VMEM((tile_n, 2 * H), jnp.float32)],
        ),
        compiler_params=pltpu.CompilerParams(
            dimension_semantics=("parallel", "arbitrary"),
            vmem_limit_bytes=32 * 1024 * 1024,
        ),
    )(amax, dst, eft, attn_mat)


# ------------------------------ Wrapper module -------------------------------
def _round_up(x, m):
    return ((x + m - 1) // m) * m


def _pad_rows(x, rows):
    pad = rows - x.shape[0]
    if pad == 0:
        return x
    widths = [(0, pad)] + [(0, 0)] * (x.ndim - 1)
    return jnp.pad(x, widths)


def metapath_specific_forward(features, edge_metapath_indices, edge_dst,
                              n_dst_nodes, params, *, out_dim, num_heads,
                              alpha=0.01, tile_e=512, tile_n=256,
                              mxu_bf16=True):
    """Returns node features [n_dst_nodes, num_heads, out_dim]."""
    D, nh = out_dim, num_heads
    H = nh * D
    E, L = edge_metapath_indices.shape
    cdt = jnp.bfloat16 if mxu_bf16 else jnp.float32

    # Clamp tiles to the padded problem size (keeps small problems on 1 tile,
    # keeps large problems on >=2 parallel tiles for v7x's two TensorCores).
    tile_e = min(tile_e, _round_up(E, 128))
    tile_n = min(tile_n, _round_up(n_dst_nodes, 128))
    E_pad = _round_up(E, tile_e)
    N_pad = _round_up(n_dst_nodes, tile_n)

    # Glue: gather (F.embedding) + lane-dense reshape (+ bf16 storage).
    edata = jnp.take(features, edge_metapath_indices, axis=0)       # (E, L, D)
    edata_flat = _pad_rows(edata.reshape(E, L * D).astype(cdt), E_pad)

    # Glue: block-diag repeated W_ih -> one K=L*D projection inside kernel 1.
    w_ih = params["w_ih"].astype(jnp.float32)                       # (D, H)
    wih_block = jax.scipy.linalg.block_diag(*([w_ih] * L)).astype(cdt)
    w_hh = params["w_hh"].astype(cdt)                               # (H, H)
    b = params["b"].astype(jnp.float32)                             # (1, H)

    # Glue: block-structured attention matrix so one (H,H) matmul both takes
    # the per-head dot product and broadcasts it across that head's columns.
    attn = params["attn"].astype(jnp.float32)                       # (1, nh, D)
    blocks = [jnp.broadcast_to(attn[0, h][:, None], (D, D)) for h in range(nh)]
    attn_mat = jax.scipy.linalg.block_diag(*blocks).astype(cdt)     # (H, H)

    # Kernel 1: RNN recurrence + per-tile masked logit max.
    eft, amax_tiles = run_rnn_attn(
        edata_flat, wih_block, w_hh, b, attn_mat, seq_len=L, hidden=H,
        alpha=alpha, n_valid=E, tile_e=tile_e, compute_dtype=cdt)

    # Tiny reduce over n_tiles values (softmax is shift-invariant per segment,
    # so a single global shift is exact; padded edges were masked out).
    amax = jnp.max(amax_tiles).astype(jnp.float32).reshape(1)

    # Padded edges get dst = -1 -> never match a node row in kernel 2.
    dst = jnp.concatenate(
        [edge_dst.astype(jnp.int32),
         jnp.full((E_pad - E,), -1, jnp.int32)]).reshape(1, E_pad)

    # Kernel 2: stable edge-softmax + weighted scatter-sum (E-tiled reduction).
    ft_flat = run_attn_agg(amax, dst, eft, attn_mat, alpha=alpha,
                           tile_n=tile_n, tile_e=tile_e, n_pad=N_pad,
                           hidden=H, compute_dtype=cdt)              # (N_pad, H)
    return ft_flat[:n_dst_nodes].reshape(n_dst_nodes, nh, D)


# ---------------------------- Pure-JAX reference -----------------------------
def reference_forward(features, edge_metapath_indices, edge_dst, n_dst_nodes,
                      params, *, out_dim, num_heads, alpha=0.01):
    D, nh = out_dim, num_heads
    edata = jnp.take(features, edge_metapath_indices, axis=0)
    E, L, _ = edata.shape
    h = jnp.zeros((E, nh * D), jnp.float32)
    for t in range(L):
        h = jnp.tanh(edata[:, t, :] @ params["w_ih"] + h @ params["w_hh"]
                     + params["b"])
    eft = h.reshape(E, nh, D)
    a = (eft * params["attn"]).sum(-1)                              # (E, nh)
    a = jnp.where(a > 0, a, alpha * a)
    a = a - jax.ops.segment_max(a, edge_dst, num_segments=n_dst_nodes)[edge_dst]
    exp_a = jnp.exp(a)
    denom = jax.ops.segment_sum(exp_a, edge_dst, num_segments=n_dst_nodes)
    att = exp_a / denom[edge_dst]
    ft = jax.ops.segment_sum(eft * att[..., None], edge_dst,
                             num_segments=n_dst_nodes)
    return ft


# ----------------------------------- Main ------------------------------------
if __name__ == "__main__":
    out_dim = 32       # D
    num_heads = 4      # nh  -> H = 128
    alpha = 0.01
    n_feat_nodes = 20  # rows of the feature table
    n_dst_nodes = 16   # nodes of the metapath-based graph
    E = 32             # number of metapath instances (edges)
    L = 4              # metapath length
    H = num_heads * out_dim

    key = jax.random.PRNGKey(0)
    ks = jax.random.split(key, 7)

    features = jax.random.normal(ks[0], (n_feat_nodes, out_dim), jnp.float32)
    edge_metapath_indices = jax.random.randint(ks[1], (E, L), 0, n_feat_nodes)
    edge_dst = jax.random.randint(ks[2], (E,), 0, n_dst_nodes)

    # Deterministic synthetic parameters (shapes match nn.RNN(D, H) + attn).
    params = {
        "w_ih": 0.2 * jax.random.normal(ks[3], (out_dim, H), jnp.float32),
        "w_hh": 0.2 * jax.random.normal(ks[4], (H, H), jnp.float32),
        "b": 0.1 * jax.random.normal(ks[5], (1, H), jnp.float32),
        "attn": 1.414 * jax.random.normal(ks[6], (1, num_heads, out_dim),
                                          jnp.float32),
    }

    ref = reference_forward(
        features, edge_metapath_indices, edge_dst, n_dst_nodes, params,
        out_dim=out_dim, num_heads=num_heads, alpha=alpha)

    # --- exact path: f32 MXU operands, must match the reference tightly. ---
    out_f32 = metapath_specific_forward(
        features, edge_metapath_indices, edge_dst, n_dst_nodes, params,
        out_dim=out_dim, num_heads=num_heads, alpha=alpha, mxu_bf16=False)
    out_f32 = jax.block_until_ready(out_f32)
    assert out_f32.shape == (n_dst_nodes, num_heads, out_dim)
    assert jnp.allclose(out_f32, ref, atol=1e-4, rtol=1e-4), (
        "f32 path mismatch vs reference: max abs err = %e"
        % float(jnp.max(jnp.abs(out_f32 - ref))))

    # --- fast path (default): bf16 MXU operands, f32 state/accumulation. ---
    # Tolerance is loosened because bf16 operand rounding propagates through
    # the 4-step tanh recurrence and the softmax; the algorithm itself is
    # proven exact by the f32 assert above.
    out_bf16 = metapath_specific_forward(
        features, edge_metapath_indices, edge_dst, n_dst_nodes, params,
        out_dim=out_dim, num_heads=num_heads, alpha=alpha, mxu_bf16=True)
    out_bf16 = jax.block_until_ready(out_bf16)
    assert out_bf16.shape == (n_dst_nodes, num_heads, out_dim)
    assert jnp.allclose(out_bf16, ref, atol=8e-2, rtol=8e-2), (
        "bf16 path mismatch vs reference: max abs err = %e"
        % float(jnp.max(jnp.abs(out_bf16 - ref))))

    print("KERNEL_OK")
</pallas_src>

<mosaic_0001>
module attributes {stable_mosaic.version = 11 : i64} {
  func.func @rnn_attn_kernel(%arg0: i32, %arg1: memref<128x128xf32, #tpu.memory_space<vmem>>, %arg2: memref<128x512xf32, #tpu.memory_space<vmem>>, %arg3: memref<128x128xf32, #tpu.memory_space<vmem>>, %arg4: memref<1x128xf32, #tpu.memory_space<vmem>>, %arg5: memref<128x128xf32, #tpu.memory_space<vmem>>, %arg6: memref<128x128xf32, #tpu.memory_space<vmem>>, %arg7: memref<1x1x128xf32, #tpu.memory_space<vmem>>) attributes {dimension_semantics = [#tpu.dimension_semantics<parallel>], iteration_bounds = array<i64: 1>, scalar_prefetch = 0 : i64, scratch_operands = 0 : i64, tpu.core_type = #tpu.core_type<tc>, window_params = [{transform_indices = @transform_0, window_bounds = array<i64: 128, 128>}, {pipeline_mode = #tpu.pipeline_mode<synchronous>, transform_indices = @transform_1, window_bounds = array<i64: 128, 512>}, {pipeline_mode = #tpu.pipeline_mode<synchronous>, transform_indices = @transform_2, window_bounds = array<i64: 128, 128>}, {pipeline_mode = #tpu.pipeline_mode<synchronous>, transform_indices = @transform_3, window_bounds = array<i64: 1, 128>}, {pipeline_mode = #tpu.pipeline_mode<synchronous>, transform_indices = @transform_4, window_bounds = array<i64: 128, 128>}, {transform_indices = @transform_5, window_bounds = array<i64: 128, 128>}, {transform_indices = @transform_6, window_bounds = array<i64: 1, 1, 128>}]} {
    %c0 = arith.constant 0 : index
    %c0_0 = arith.constant 0 : index
    %0 = vector.load %arg1[%c0, %c0_0] : memref<128x128xf32, #tpu.memory_space<vmem>>, vector<128x128xf32>
    %c0_1 = arith.constant 0 : index
    %c0_2 = arith.constant 0 : index
    %1 = vector.load %arg2[%c0_1, %c0_2] : memref<128x512xf32, #tpu.memory_space<vmem>>, vector<128x512xf32>
    %c0_3 = arith.constant 0 : index
    %c0_4 = arith.constant 0 : index
    %2 = vector.load %arg3[%c0_3, %c0_4] : memref<128x128xf32, #tpu.memory_space<vmem>>, vector<128x128xf32>
    %c0_5 = arith.constant 0 : index
    %c0_6 = arith.constant 0 : index
    %3 = vector.load %arg5[%c0_5, %c0_6] : memref<128x128xf32, #tpu.memory_space<vmem>>, vector<128x128xf32>
    %c0_7 = arith.constant 0 : index
    %c0_8 = arith.constant 0 : index
    %4 = vector.load %arg4[%c0_7, %c0_8] : memref<1x128xf32, #tpu.memory_space<vmem>>, vector<1x128xf32>
    %cst = arith.constant dense<0.000000e+00> : vector<128x512xf32>
    %5 = tpu.matmul %0, %1, %cst {dimension_numbers = #tpu.dot_dimension_numbers<[1], [0], [0], [1], [0, 0, 1, 1], [], []>} : vector<128x128xf32>, vector<128x512xf32>, vector<128x512xf32> -> vector<128x512xf32>
    %6 = vector.extract_strided_slice %5 {offsets = [0, 0], sizes = [64, 512], strides = [1, 1]} : vector<128x512xf32> to vector<64x512xf32>
    %7 = vector.extract_strided_slice %6 {offsets = [0, 0], sizes = [64, 128], strides = [1, 1]} : vector<64x512xf32> to vector<64x128xf32>
    %8 = vector.broadcast %4 : vector<1x128xf32> to vector<64x128xf32>
    %9 = arith.addf %7, %8 : vector<64x128xf32>
    %10 = math.tanh %9 : vector<64x128xf32>
    %cst_9 = arith.constant dense<0.000000e+00> : vector<64x128xf32>
    %11 = tpu.matmul %10, %2, %cst_9 {dimension_numbers = #tpu.dot_dimension_numbers<[1], [0], [0], [1], [0, 0, 1, 1], [], []>} : vector<64x128xf32>, vector<128x128xf32>, vector<64x128xf32> -> vector<64x128xf32>
    %12 = vector.extract_strided_slice %6 {offsets = [0, 128], sizes = [64, 128], strides = [1, 1]} : vector<64x512xf32> to vector<64x128xf32>
    %13 = arith.addf %12, %11 : vector<64x128xf32>
    %14 = vector.broadcast %4 : vector<1x128xf32> to vector<64x128xf32>
    %15 = arith.addf %13, %14 : vector<64x128xf32>
    %16 = math.tanh %15 : vector<64x128xf32>
    %cst_10 = arith.constant dense<0.000000e+00> : vector<64x128xf32>
    %17 = tpu.matmul %16, %2, %cst_10 {dimension_numbers = #tpu.dot_dimension_numbers<[1], [0], [0], [1], [0, 0, 1, 1], [], []>} : vector<64x128xf32>, vector<128x128xf32>, vector<64x128xf32> -> vector<64x128xf32>
    %18 = vector.extract_strided_slice %6 {offsets = [0, 256], sizes = [64, 128], strides = [1, 1]} : vector<64x512xf32> to vector<64x128xf32>
    %19 = arith.addf %18, %17 : vector<64x128xf32>
    %20 = vector.broadcast %4 : vector<1x128xf32> to vector<64x128xf32>
    %21 = arith.addf %19, %20 : vector<64x128xf32>
    %22 = math.tanh %21 : vector<64x128xf32>
    %cst_11 = arith.constant dense<0.000000e+00> : vector<64x128xf32>
    %23 = tpu.matmul %22, %2, %cst_11 {dimension_numbers = #tpu.dot_dimension_numbers<[1], [0], [0], [1], [0, 0, 1, 1], [], []>} : vector<64x128xf32>, vector<128x128xf32>, vector<64x128xf32> -> vector<64x128xf32>
    %24 = vector.extract_strided_slice %6 {offsets = [0, 384], sizes = [64, 128], strides = [1, 1]} : vector<64x512xf32> to vector<64x128xf32>
    %25 = arith.addf %24, %23 : vector<64x128xf32>
    %26 = vector.broadcast %4 : vector<1x128xf32> to vector<64x128xf32>
    %27 = arith.addf %25, %26 : vector<64x128xf32>
    %28 = math.tanh %27 : vector<64x128xf32>
    %29 = vector.extract_strided_slice %5 {offsets = [64, 0], sizes = [64, 512], strides = [1, 1]} : vector<128x512xf32> to vector<64x512xf32>
    %30 = vector.extract_strided_slice %29 {offsets = [0, 0], sizes = [64, 128], strides = [1, 1]} : vector<64x512xf32> to vector<64x128xf32>
    %31 = vector.broadcast %4 : vector<1x128xf32> to vector<64x128xf32>
    %32 = arith.addf %30, %31 : vector<64x128xf32>
    %33 = math.tanh %32 : vector<64x128xf32>
    %cst_12 = arith.constant dense<0.000000e+00> : vector<64x128xf32>
    %34 = tpu.matmul %33, %2, %cst_12 {dimension_numbers = #tpu.dot_dimension_numbers<[1], [0], [0], [1], [0, 0, 1, 1], [], []>} : vector<64x128xf32>, vector<128x128xf32>, vector<64x128xf32> -> vector<64x128xf32>
    %35 = vector.extract_strided_slice %29 {offsets = [0, 128], sizes = [64, 128], strides = [1, 1]} : vector<64x512xf32> to vector<64x128xf32>
    %36 = arith.addf %35, %34 : vector<64x128xf32>
    %37 = vector.broadcast %4 : vector<1x128xf32> to vector<64x128xf32>
    %38 = arith.addf %36, %37 : vector<64x128xf32>
    %39 = math.tanh %38 : vector<64x128xf32>
    %cst_13 = arith.constant dense<0.000000e+00> : vector<64x128xf32>
    %40 = tpu.matmul %39, %2, %cst_13 {dimension_numbers = #tpu.dot_dimension_numbers<[1], [0], [0], [1], [0, 0, 1, 1], [], []>} : vector<64x128xf32>, vector<128x128xf32>, vector<64x128xf32> -> vector<64x128xf32>
    %41 = vector.extract_strided_slice %29 {offsets = [0, 256], sizes = [64, 128], strides = [1, 1]} : vector<64x512xf32> to vector<64x128xf32>
    %42 = arith.addf %41, %40 : vector<64x128xf32>
    %43 = vector.broadcast %4 : vector<1x128xf32> to vector<64x128xf32>
    %44 = arith.addf %42, %43 : vector<64x128xf32>
    %45 = math.tanh %44 : vector<64x128xf32>
    %cst_14 = arith.constant dense<0.000000e+00> : vector<64x128xf32>
    %46 = tpu.matmul %45, %2, %cst_14 {dimension_numbers = #tpu.dot_dimension_numbers<[1], [0], [0], [1], [0, 0, 1, 1], [], []>} : vector<64x128xf32>, vector<128x128xf32>, vector<64x128xf32> -> vector<64x128xf32>
    %47 = vector.extract_strided_slice %29 {offsets = [0, 384], sizes = [64, 128], strides = [1, 1]} : vector<64x512xf32> to vector<64x128xf32>
    %48 = arith.addf %47, %46 : vector<64x128xf32>
    %49 = vector.broadcast %4 : vector<1x128xf32> to vector<64x128xf32>
    %50 = arith.addf %48, %49 : vector<64x128xf32>
    %51 = math.tanh %50 : vector<64x128xf32>
    %c0_15 = arith.constant 0 : index
    %c0_16 = arith.constant 0 : index
    %52 = vector.load %arg6[%c0_15, %c0_16] : memref<128x128xf32, #tpu.memory_space<vmem>>, vector<64x128xf32>
    tpu.vector_store %arg6[%c0_15, %c0_16], %28 {strides = array<i32>} : memref<128x128xf32, #tpu.memory_space<vmem>>, vector<64x128xf32>,
    %c64 = arith.constant 64 : index
    %c0_17 = arith.constant 0 : index
    %53 = vector.load %arg6[%c64, %c0_17] : memref<128x128xf32, #tpu.memory_space<vmem>>, vector<64x128xf32>
    tpu.vector_store %arg6[%c64, %c0_17], %51 {strides = array<i32>} : memref<128x128xf32, #tpu.memory_space<vmem>>, vector<64x128xf32>,
    %c128_i32 = arith.constant 128 : i32
    %54 = arith.muli %arg0, %c128_i32 : i32
    %cst_18 = arith.constant dense<0.000000e+00> : vector<64x128xf32>
    %55 = tpu.matmul %28, %3, %cst_18 {dimension_numbers = #tpu.dot_dimension_numbers<[1], [0], [0], [1], [0, 0, 1, 1], [], []>} : vector<64x128xf32>, vector<128x128xf32>, vector<64x128xf32> -> vector<64x128xf32>
    %cst_19 = arith.constant 0.000000e+00 : f32
    %56 = vector.broadcast %cst_19 : f32 to vector<64x128xf32>
    %57 = arith.cmpf ogt, %55, %56 : vector<64x128xf32>
    %cst_20 = arith.constant 0.00999999977 : f32
    %58 = vector.broadcast %cst_20 : f32 to vector<64x128xf32>
    %59 = arith.mulf %58, %55 : vector<64x128xf32>
    %60 = arith.select %57, %55, %59 : vector<64x128xi1>, vector<64x128xf32>
    %61 = tpu.iota {dimensions = array<i32: 0>} : vector<64x128xi32>
    %62 = vector.broadcast %54 : i32 to vector<64x128xi32>
    %63 = arith.addi %62, %61 : vector<64x128xi32>
    %c32_i32 = arith.constant 32 : i32
    %64 = vector.broadcast %c32_i32 : i32 to vector<64x128xi32>
    %65 = arith.cmpi slt, %63, %64 : vector<64x128xi32>
    %cst_21 = arith.constant -1.000000e+30 : f32
    %66 = vector.broadcast %cst_21 : f32 to vector<64x128xf32>
    %67 = arith.select %65, %60, %66 : vector<64x128xi1>, vector<64x128xf32>
    %cst_22 = arith.constant dense<0xFF800000> : vector<128xf32>
    %68 = vector.multi_reduction <maximumf>, %67, %cst_22 [0] : vector<64x128xf32> to vector<128xf32>
    %69 = vector.shape_cast %68 : vector<128xf32> to vector<1x128xf32>
    %c64_i32 = arith.constant 64 : i32
    %70 = arith.addi %54, %c64_i32 : i32
    %cst_23 = arith.constant dense<0.000000e+00> : vector<64x128xf32>
    %71 = tpu.matmul %51, %3, %cst_23 {dimension_numbers = #tpu.dot_dimension_numbers<[1], [0], [0], [1], [0, 0, 1, 1], [], []>} : vector<64x128xf32>, vector<128x128xf32>, vector<64x128xf32> -> vector<64x128xf32>
    %cst_24 = arith.constant 0.000000e+00 : f32
    %72 = vector.broadcast %cst_24 : f32 to vector<64x128xf32>
    %73 = arith.cmpf ogt, %71, %72 : vector<64x128xf32>
    %cst_25 = arith.constant 0.00999999977 : f32
    %74 = vector.broadcast %cst_25 : f32 to vector<64x128xf32>
    %75 = arith.mulf %74, %71 : vector<64x128xf32>
    %76 = arith.select %73, %71, %75 : vector<64x128xi1>, vector<64x128xf32>
    %77 = tpu.iota {dimensions = array<i32: 0>} : vector<64x128xi32>
    %78 = vector.broadcast %70 : i32 to vector<64x128xi32>
    %79 = arith.addi %78, %77 : vector<64x128xi32>
    %c32_i32_26 = arith.constant 32 : i32
    %80 = vector.broadcast %c32_i32_26 : i32 to vector<64x128xi32>
    %81 = arith.cmpi slt, %79, %80 : vector<64x128xi32>
    %cst_27 = arith.constant -1.000000e+30 : f32
    %82 = vector.broadcast %cst_27 : f32 to vector<64x128xf32>
    %83 = arith.select %81, %76, %82 : vector<64x128xi1>, vector<64x128xf32>
    %cst_28 = arith.constant dense<0xFF800000> : vector<128xf32>
    %84 = vector.multi_reduction <maximumf>, %83, %cst_28 [0] : vector<64x128xf32> to vector<128xf32>
    %85 = vector.shape_cast %84 : vector<128xf32> to vector<1x128xf32>
    %86 = arith.maximumf %69, %85 : vector<1x128xf32>
    %87 = vector.shape_cast %86 : vector<1x128xf32> to vector<1x1x128xf32>
    %c0_29 = arith.constant 0 : index
    %c0_30 = arith.constant 0 : index
    %c0_31 = arith.constant 0 : index
    %88 = vector.load %arg7[%c0_29, %c0_30, %c0_31] : memref<1x1x128xf32, #tpu.memory_space<vmem>>, vector<1x1x128xf32>
    tpu.vector_store %arg7[%c0_29, %c0_30, %c0_31], %87 {strides = array<i32>} : memref<1x1x128xf32, #tpu.memory_space<vmem>>, vector<1x1x128xf32>,
    return
  }
  func.func @transform_0(%arg0: i32) -> (i32, i32) {
    %c0_i32 = arith.constant 0 : i32
    %c0_i32_0 = arith.constant 0 : i32
    return %arg0, %c0_i32 : i32, i32
  }
  func.func @transform_1(%arg0: i32) -> (i32, i32) {
    %c0_i32 = arith.constant 0 : i32
    %c0_i32_0 = arith.constant 0 : i32
    %c0_i32_1 = arith.constant 0 : i32
    return %c0_i32, %c0_i32_0 : i32, i32
  }
  func.func @transform_2(%arg0: i32) -> (i32, i32) {
    %c0_i32 = arith.constant 0 : i32
    %c0_i32_0 = arith.constant 0 : i32
    %c0_i32_1 = arith.constant 0 : i32
    return %c0_i32, %c0_i32_0 : i32, i32
  }
  func.func @transform_3(%arg0: i32) -> (i32, i32) {
    %c0_i32 = arith.constant 0 : i32
    %c0_i32_0 = arith.constant 0 : i32
    %c0_i32_1 = arith.constant 0 : i32
    return %c0_i32, %c0_i32_0 : i32, i32
  }
  func.func @transform_4(%arg0: i32) -> (i32, i32) {
    %c0_i32 = arith.constant 0 : i32
    %c0_i32_0 = arith.constant 0 : i32
    %c0_i32_1 = arith.constant 0 : i32
    return %c0_i32, %c0_i32_0 : i32, i32
  }
  func.func @transform_5(%arg0: i32) -> (i32, i32) {
    %c0_i32 = arith.constant 0 : i32
    %c0_i32_0 = arith.constant 0 : i32
    return %arg0, %c0_i32 : i32, i32
  }
  func.func @transform_6(%arg0: i32) -> (i32, i32, i32) {
    %c0_i32 = arith.constant 0 : i32
    %c0_i32_0 = arith.constant 0 : i32
    %c0_i32_1 = arith.constant 0 : i32
    return %arg0, %c0_i32, %c0_i32_0 : i32, i32, i32
  }
}

</mosaic_0001>

<bundles_post_ra>
// kernel: tpu_custom_call.1
= control target key start
LH: loop header
LB: loop body
LE: loop exit
PB: predicated region body
PF: predicated region fallthrough
CT: control target
= control target key end

     0   :  { %12 = vsyncpa [#allocation3], 0  ;;  %s3496_s0 = inlined_call_operand.hbm [shape: f32[128,128], index: 0, kind: input, shape index: {}]   ;;  %s3497_s1 = inlined_call_operand.hbm [shape: f32[128,512], index: 1, kind: input, shape index: {}]   ;;  %s3498_s2 = inlined_call_operand.hbm [shape: f32[128,128], index: 2, kind: input, shape index: {}]   ;;  %s3499_s3 = inlined_call_operand.vmem [shape: f32[1,128], index: 3, kind: input, shape index: {}]   ;;  %s3500_s4 = inlined_call_operand.hbm [shape: f32[128,128], index: 4, kind: input, shape index: {}]   ;;  %s3501_s5 = inlined_call_operand.hbm [shape: f32[128,128], index: 5, kind: output, shape index: {0}]   ;;  %s3502_s6 = inlined_call_operand.hbm [shape: f32[1,1,128], index: 6, kind: output, shape index: {1}]  }
   0x1   :  { %13 = vsyncpa [#allocation6], 0 }
   0x2   :  { %14 = vsyncpa [#allocation9], 0 }
   0x3   :  { %15 = vsyncpa [#allocation4], 0 }
   0x4   :  { %16 = vsyncpa [#allocation12], 0  ;;  %s2870_s21 = smov [#allocation5]   ;;  %s2728_s25 = scalar_lea.hbm %s3497_s1, 8192 }
   0x5   :  { %s34_s22 = sshll.u32 %s2870_s21, 4  ;;  %p2729_p0 = scmp.ne.s32.totalorder %s3497_s1, %s2728_s25  ;;  %s35_s22 = int_to_ptr.vmem [resolvable:$true] %s34_s22 }
   0x6   :  { %p2732_p1 = scmp.lt.u32.totalorder %s2728_s25, %s3497_s1 }
   0x8   :  { %p2734_p2 = pnand %p2732_p1, %p2729_p0 }
   0xa   :  { %2737 = shalt.err (!%p2734_p2)
}
   0xb   :  { %s2738_s30 = scalar_lea.vmem %s35_s22, 8192  ;;  %p2743_p4 = scmp.lt.s32.totalorder %s35_s22, %s35_s22 }
   0xc   :  { %p2739_p3 = scmp.ne.s32.totalorder %s35_s22, %s2738_s30  ;;  %p2744_p5 = scmp.lt.s32.totalorder %s2738_s30, %s2738_s30 }
   0xe   :  { %p2745_p6 = por %p2744_p5, %p2743_p4 }
  0x10   :  { %p2746_p7 = pnand %p2745_p6, %p2739_p3 }
  0x12   :  { %2749 = shalt.err (!%p2746_p7)
}
  0x13   :  { %s2871_s7 = smov 512   ;;  %s2872_s8 = smov 32  }
  0x14   :  { %40 = dma.hbm_to_vmem [thread:$0]  %s3497_s1, 8192, %s35_s22, [#allocation6], %s2871_s7, %s2871_s7, %s2872_s8  }
  0x15   :  { %s2873_s11 = smov [#allocation2]   ;;  %s2750_s15 = scalar_lea.hbm %s3496_s0, 2048 }
  0x16   :  { %s22_s12 = sshll.u32 %s2873_s11, 4  ;;  %p2751_p8 = scmp.ne.s32.totalorder %s3496_s0, %s2750_s15  ;;  %s23_s12 = int_to_ptr.vmem [resolvable:$true] %s22_s12 }
  0x17   :  { %p2754_p9 = scmp.lt.u32.totalorder %s2750_s15, %s3496_s0 }
  0x19   :  { %p2756_p10 = pnand %p2754_p9, %p2751_p8 }
  0x1b   :  { %2759 = shalt.err (!%p2756_p10)
}
  0x1c   :  { %s2760_s20 = scalar_lea.vmem %s23_s12, 2048  ;;  %p2765_p12 = scmp.lt.s32.totalorder %s23_s12, %s23_s12 }
  0x1d   :  { %p2761_p11 = scmp.ne.s32.totalorder %s23_s12, %s2760_s20  ;;  %p2766_p13 = scmp.lt.s32.totalorder %s2760_s20, %s2760_s20 }
  0x1f   :  { %p2767_p0 = por %p2766_p13, %p2765_p12 }
  0x21   :  { %p2768_p1 = pnand %p2767_p0, %p2761_p11 }
  0x23   :  { %2771 = shalt.err (!%p2768_p1)
}
  0x24   :  { %s2874_s1 = smov 128   ;;  %s2875_s21 = smov 8  }
  0x25   :  { %28 = dma.hbm_to_vmem [thread:$0]  %s3496_s0, 2048, %s23_s12, [#allocation3], %s2874_s1, %s2874_s1, %s2875_s21  }
  0x26   :  { %s2876_s24 = smov [#allocation7]   ;;  %s2877_s26 = smov [#allocation8]  }
  0x27   :  { %s46_s25 = sshll.u32 %s2876_s24, 4  ;;  %s60_s27 = sshll.u32 %s2877_s26, 4  ;;  %s47_s25 = int_to_ptr.vmem [resolvable:$true] %s46_s25  ;;  %s2944_s27 = int_to_ptr.vmem [resolvable:$true] %s60_s27 }
  0x28   :  { %s2772_s30 = scalar_lea.hbm %s3498_s2, 2048 }
  0x29   :  { %p2773_p2 = scmp.ne.s32.totalorder %s3498_s2, %s2772_s30  ;;  %p2776_p3 = scmp.lt.u32.totalorder %s2772_s30, %s3498_s2 }
  0x2b   :  { %p2778_p4 = pnand %p2776_p3, %p2773_p2 }
  0x2d   :  { %2781 = shalt.err (!%p2778_p4)
}
  0x2e   :  { %s2782_s0 = scalar_lea.vmem %s47_s25, 2048  ;;  %p2787_p6 = scmp.lt.s32.totalorder %s47_s25, %s47_s25 }
  0x2f   :  { %p2783_p5 = scmp.ne.s32.totalorder %s47_s25, %s2782_s0  ;;  %p2788_p7 = scmp.lt.s32.totalorder %s2782_s0, %s2782_s0 }
  0x31   :  { %p2789_p8 = por %p2788_p7, %p2787_p6 }
  0x33   :  { %p2790_p9 = pnand %p2789_p8, %p2783_p5 }
  0x35   :  { %2793 = shalt.err (!%p2790_p9)
}
  0x36   :  { %52 = dma.hbm_to_vmem [thread:$0]  %s3498_s2, 2048, %s47_s25, [#allocation6], %s2874_s1, %s2874_s1, %s2875_s21  }
  0x37   :  { %s2794_s15 = scalar_lea.hbm %s3500_s4, 2048 }
  0x38   :  { %p2795_p10 = scmp.ne.s32.totalorder %s3500_s4, %s2794_s15  ;;  %p2798_p11 = scmp.lt.u32.totalorder %s2794_s15, %s3500_s4 }
  0x3a   :  { %p2800_p12 = pnand %p2798_p11, %p2795_p10 }
  0x3c   :  { %2803 = shalt.err (!%p2800_p12)
}
  0x3d   :  { %s2804_s20 = scalar_lea.vmem %s2944_s27, 2048  ;;  %p2809_p0 = scmp.lt.s32.totalorder %s2944_s27, %s2944_s27 }
  0x3e   :  { %p2805_p13 = scmp.ne.s32.totalorder %s2944_s27, %s2804_s20  ;;  %p2810_p1 = scmp.lt.s32.totalorder %s2804_s20, %s2804_s20 }
  0x40   :  { %p2811_p2 = por %p2810_p1, %p2809_p0 }
  0x42   :  { %p2812_p3 = pnand %p2811_p2, %p2805_p13 }
  0x44   :  { %2815 = shalt.err (!%p2812_p3)
}
  0x45   :  { %66 = dma.hbm_to_vmem [thread:$0]  %s3500_s4, 2048, %s2944_s27, [#allocation9], %s2874_s1, %s2874_s1, %s2875_s21  }
  0x46   :  { %2860 = dma.done.wait [#allocation3], 2048  }
  0x47   :  { %2861 = vsyncadd [#allocation3], 4294965248 }
  0x48   :  { %2862 = dma.done.wait [#allocation6], 10240  }
  0x49   :  { %2863 = vsyncadd [#allocation6], 4294957056 }
  0x4a   :  { %2864 = dma.done.wait [#allocation9], 2048  }
  0x4b   :  { %2865 = vsyncadd [#allocation9], 4294965248  ;;  %v2878_v0 = vmov 0.0   ;;  %v96_v1 = vld [vmem:[#allocation5 + $0x8] sm:$0xff]  ;;  %v95_v3 = vld [vmem:[#allocation5] sm:$0xff]  ;;  %s2881_s27 = smov [#allocation11]  }
  0x4c   :  { %256 = vmatprep.mubr.f32.mxu0 %v2878_v0  ;;  %417 = vmatprep.mubr.f32.mxu1 %v2878_v0  ;;  %v100_v2 = vld [vmem:[#allocation5 + $0x28] sm:$0xff]  ;;  %v99_v5 = vld [vmem:[#allocation5 + $0x20] sm:$0xff]  ;;  %v161_v52 = vld [vmem:[#allocation7 + $0x10] sm:$0xff]  ;;  %s1707_s28 = sshll.u32 %s2881_s27, 4  ;;  %s1708_s28 = int_to_ptr.vmem [resolvable:$true] %s1707_s28 }
  0x4d   :  { %v2267_v4 = vpack.c.bf16 %v100_v2, %v96_v1  ;;  %v104_v6 = vld [vmem:[#allocation5 + $0x48] sm:$0xff]  ;;  %v2269_v8 = vpack.c.bf16 %v99_v5, %v95_v3  ;;  %v103_v10 = vld [vmem:[#allocation5 + $0x40] sm:$0xff]  ;;  %v162_v53 = vld [vmem:[#allocation7 + $0x18] sm:$0xff] }
  0x4e   :  { %v108_v7 = vld [vmem:[#allocation5 + $0x68] sm:$0xff]  ;;  %v107_v11 = vld [vmem:[#allocation5 + $0x60] sm:$0xff]  ;;  %v2988_v55 = vpack.c.bf16 %v162_v53, %v161_v52  ;;  %v165_v60 = vld [vmem:[#allocation7 + $0x30] sm:$0xff] }
  0x4f   :  { %v2271_v9 = vpack.c.bf16 %v108_v7, %v104_v6  ;;  %v112_v12 = vld [vmem:[#allocation5 + $0x88] sm:$0xff]  ;;  %2268 = vmatprep.subr.bf16.mxu0 %v2267_v4  ;;  %v2273_v14 = vpack.c.bf16 %v107_v11, %v103_v10  ;;  %v111_v16 = vld [vmem:[#allocation5 + $0x80] sm:$0xff]  ;;  %v166_v61 = vld [vmem:[#allocation7 + $0x38] sm:$0xff] }
  0x50   :  { %v116_v13 = vld [vmem:[#allocation5 + $0xa8] sm:$0xff]  ;;  %2270 = vmatpush1.bf16.msra.mxu0 %v2269_v8  ;;  %v115_v17 = vld [vmem:[#allocation5 + $0xa0] sm:$0xff]  ;;  %v3000_v62 = vld [vmem:[#allocation2 + $0x10] sm:$0xff]  ;;  %v3004_v63 = vpack.c.bf16 %v166_v61, %v165_v60 }
  0x51   :  { %2272 = vmatprep.subr.bf16.mxu0 %v2271_v9  ;;  %v2275_v15 = vpack.c.bf16 %v116_v13, %v112_v12  ;;  %v120_v18 = vld [vmem:[#allocation5 + $0xc8] sm:$0xff]  ;;  %v2277_v20 = vpack.c.bf16 %v115_v17, %v111_v16  ;;  %v119_v22 = vld [vmem:[#allocation5 + $0xc0] sm:$0xff]  ;;  %v3008_v3 = vld [vmem:[#allocation2 + $0x18] sm:$0xff] }
  0x52   :  { %v124_v19 = vld [vmem:[#allocation5 + $0xe8] sm:$0xff]  ;;  %v123_v23 = vld [vmem:[#allocation5 + $0xe0] sm:$0xff]  ;;  %v169_v5 = vld [vmem:[#allocation7 + $0x50] sm:$0xff] }
  0x53   :  { %v2279_v21 = vpack.c.bf16 %v124_v19, %v120_v18  ;;  %v128_v24 = vld [vmem:[#allocation5 + $0x108] sm:$0xff]  ;;  %v2281_v26 = vpack.c.bf16 %v123_v23, %v119_v22  ;;  %v127_v28 = vld [vmem:[#allocation5 + $0x100] sm:$0xff]  ;;  %v170_v6 = vld [vmem:[#allocation7 + $0x58] sm:$0xff] }
  0x54   :  { %2274 = vmatpush1.bf16.msra.mxu0 %v2273_v14  ;;  %v132_v25 = vld [vmem:[#allocation5 + $0x128] sm:$0xff]  ;;  %v131_v29 = vld [vmem:[#allocation5 + $0x120] sm:$0xff]  ;;  %v3020_v8 = vpack.c.bf16 %v170_v6, %v169_v5  ;;  %v3030_v10 = vld [vmem:[#allocation2 + $0x30] sm:$0xff] }
  0x55   :  { %2276 = vmatprep.subr.bf16.mxu0 %v2275_v15  ;;  %v2283_v27 = vpack.c.bf16 %v132_v25, %v128_v24  ;;  %v136_v30 = vld [vmem:[#allocation5 + $0x148] sm:$0xff]  ;;  %v2285_v32 = vpack.c.bf16 %v131_v29, %v127_v28  ;;  %v135_v34 = vld [vmem:[#allocation5 + $0x140] sm:$0xff]  ;;  %v3035_v11 = vld [vmem:[#allocation2 + $0x38] sm:$0xff] }
  0x56   :  { %v140_v31 = vld [vmem:[#allocation5 + $0x168] sm:$0xff]  ;;  %v139_v35 = vld [vmem:[#allocation5 + $0x160] sm:$0xff]  ;;  %v3047_v14 = vld [vmem:[#allocation2 + $0x50] sm:$0xff] }
  0x57   :  { %v2287_v33 = vpack.c.bf16 %v140_v31, %v136_v30  ;;  %v144_v36 = vld [vmem:[#allocation5 + $0x188] sm:$0xff]  ;;  %v2289_v38 = vpack.c.bf16 %v139_v35, %v135_v34  ;;  %v143_v40 = vld [vmem:[#allocation5 + $0x180] sm:$0xff]  ;;  %v3051_v15 = vld [vmem:[#allocation2 + $0x58] sm:$0xff] }
  0x58   :  { %2278 = vmatpush1.bf16.msra.mxu0 %v2277_v20  ;;  %v148_v37 = vld [vmem:[#allocation5 + $0x1a8] sm:$0xff]  ;;  %v147_v41 = vld [vmem:[#allocation5 + $0x1a0] sm:$0xff]  ;;  %v173_v22 = vld [vmem:[#allocation7 + $0x70] sm:$0xff] }
  0x59   :  { %2280 = vmatprep.subr.bf16.mxu0 %v2279_v21  ;;  %v2291_v39 = vpack.c.bf16 %v148_v37, %v144_v36  ;;  %v152_v42 = vld [vmem:[#allocation5 + $0x1c8] sm:$0xff]  ;;  %v2293_v44 = vpack.c.bf16 %v147_v41, %v143_v40  ;;  %v151_v46 = vld [vmem:[#allocation5 + $0x1c0] sm:$0xff]  ;;  %v3067_v21 = vld [vmem:[#allocation2 + $0x70] sm:$0xff] }
  0x5a   :  { %v156_v43 = vld [vmem:[#allocation5 + $0x1e8] sm:$0xff]  ;;  %v155_v47 = vld [vmem:[#allocation5 + $0x1e0] sm:$0xff]  ;;  %v174_v23 = vld [vmem:[#allocation7 + $0x78] sm:$0xff] }
  0x5b   :  { %v2295_v45 = vpack.c.bf16 %v156_v43, %v152_v42  ;;  %v159_v48 = vld [vmem:[#allocation7] sm:$0xff]  ;;  %v160_v49 = vld [vmem:[#allocation7 + $0x8] sm:$0xff]  ;;  %v2297_v50 = vpack.c.bf16 %v155_v47, %v151_v46  ;;  %v3069_v24 = vpack.c.bf16 %v174_v23, %v173_v22  ;;  %v3075_v25 = vld [vmem:[#allocation2 + $0x78] sm:$0xff] }
  0x5c   :  { %2282 = vmatpush1.bf16.msra.mxu0 %v2281_v26  ;;  %v2983_v51 = vpack.c.bf16 %v160_v49, %v159_v48  ;;  %v2985_v54 = vld [vmem:[#allocation2] sm:$0xff]  ;;  %v164_v57 = vld [vmem:[#allocation7 + $0x28] sm:$0xff]  ;;  %v98_v26 = vld [vmem:[#allocation5 + $0x18] sm:$0xff] }
  0x5d   :  { %2284 = vmatprep.subr.bf16.mxu0 %v2283_v27  ;;  %v163_v56 = vld [vmem:[#allocation7 + $0x20] sm:$0xff]  ;;  %v2992_v58 = vld [vmem:[#allocation2 + $0x8] sm:$0xff]  ;;  %v102_v27 = vld [vmem:[#allocation5 + $0x38] sm:$0xff] }
  0x5e   :  { %v2996_v59 = vpack.c.bf16 %v164_v57, %v163_v56  ;;  %v167_v1 = vld [vmem:[#allocation7 + $0x40] sm:$0xff]  ;;  %v168_v2 = vld [vmem:[#allocation7 + $0x48] sm:$0xff]  ;;  %v97_v28 = vld [vmem:[#allocation5 + $0x10] sm:$0xff]  ;;  %v2299_v29 = vpack.c.bf16 %v102_v27, %v98_v26 }
  0x5f   :  { %v3012_v4 = vpack.c.bf16 %v168_v2, %v167_v1  ;;  %v3016_v7 = vld [vmem:[#allocation2 + $0x20] sm:$0xff]  ;;  %v3024_v9 = vld [vmem:[#allocation2 + $0x28] sm:$0xff]  ;;  %v101_v30 = vld [vmem:[#allocation5 + $0x30] sm:$0xff] }
  0x60   :  { %2286 = vmatpush1.bf16.msra.mxu0 %v2285_v32  ;;  %v3039_v12 = vld [vmem:[#allocation2 + $0x40] sm:$0xff]  ;;  %v3043_v13 = vld [vmem:[#allocation2 + $0x48] sm:$0xff]  ;;  %v106_v31 = vld [vmem:[#allocation5 + $0x58] sm:$0xff]  ;;  %2300 = vmatprep.subr.bf16.mxu1 %v2299_v29 }
  0x61   :  { %2288 = vmatprep.subr.bf16.mxu0 %v2287_v33  ;;  %v3055_v16 = vld [vmem:[#allocation2 + $0x60] sm:$0xff]  ;;  %v172_v18 = vld [vmem:[#allocation7 + $0x68] sm:$0xff]  ;;  %v110_v32 = vld [vmem:[#allocation5 + $0x78] sm:$0xff]  ;;  %v2301_v33 = vpack.c.bf16 %v101_v30, %v97_v28 }
  0x62   :  { %v171_v17 = vld [vmem:[#allocation7 + $0x60] sm:$0xff]  ;;  %v3061_v20 = vld [vmem:[#allocation2 + $0x68] sm:$0xff]  ;;  %v2303_v34 = vpack.c.bf16 %v110_v32, %v106_v31  ;;  %v105_v35 = vld [vmem:[#allocation5 + $0x50] sm:$0xff] }
  0x63   :  { %v3059_v19 = vpack.c.bf16 %v172_v18, %v171_v17  ;;  %v109_v36 = vld [vmem:[#allocation5 + $0x70] sm:$0xff]  ;;  %v114_v37 = vld [vmem:[#allocation5 + $0x98] sm:$0xff]  ;;  %2302 = vmatpush1.bf16.msra.mxu1 %v2301_v33 }
  0x64   :  { %2290 = vmatpush1.bf16.msra.mxu0 %v2289_v38  ;;  %v118_v38 = vld [vmem:[#allocation5 + $0xb8] sm:$0xff]  ;;  %2304 = vmatprep.subr.bf16.mxu1 %v2303_v34  ;;  %v113_v41 = vld [vmem:[#allocation5 + $0x90] sm:$0xff] }
  0x65   :  { %2292 = vmatprep.subr.bf16.mxu0 %v2291_v39  ;;  %v2305_v39 = vpack.c.bf16 %v109_v36, %v105_v35  ;;  %v2307_v40 = vpack.c.bf16 %v118_v38, %v114_v37  ;;  %v117_v42 = vld [vmem:[#allocation5 + $0xb0] sm:$0xff]  ;;  %v122_v43 = vld [vmem:[#allocation5 + $0xd8] sm:$0xff] }
  0x66   :  { %v121_v47 = vld [vmem:[#allocation5 + $0xd0] sm:$0xff]  ;;  %v130_v49 = vld [vmem:[#allocation5 + $0x118] sm:$0xff] }
  0x67   :  { %2306 = vmatpush1.bf16.msra.mxu1 %v2305_v39  ;;  %v125_v48 = vld [vmem:[#allocation5 + $0xf0] sm:$0xff]  ;;  %v138_v60 = vld [vmem:[#allocation5 + $0x158] sm:$0xff] }
  0x68   :  { %2294 = vmatpush1.bf16.msra.mxu0 %v2293_v44  ;;  %v126_v44 = vld [vmem:[#allocation5 + $0xf8] sm:$0xff]  ;;  %2308 = vmatprep.subr.bf16.mxu1 %v2307_v40  ;;  %v2313_v52 = vpack.c.bf16 %v125_v48, %v121_v47  ;;  %v129_v56 = vld [vmem:[#allocation5 + $0x110] sm:$0xff] }
  0x69   :  { %2296 = vmatprep.subr.bf16.mxu0 %v2295_v45  ;;  %v2309_v45 = vpack.c.bf16 %v117_v42, %v113_v41  ;;  %v2311_v46 = vpack.c.bf16 %v126_v44, %v122_v43  ;;  %v133_v57 = vld [vmem:[#allocation5 + $0x130] sm:$0xff]  ;;  %v142_v61 = vld [vmem:[#allocation5 + $0x178] sm:$0xff] }
  0x6a   :  { %v2317_v1 = vpack.c.bf16 %v133_v57, %v129_v56  ;;  %v2319_v2 = vpack.c.bf16 %v142_v61, %v138_v60  ;;  %v137_v5 = vld [vmem:[#allocation5 + $0x150] sm:$0xff]  ;;  %v146_v17 = vld [vmem:[#allocation5 + $0x198] sm:$0xff] }
  0x6b   :  { %2310 = vmatpush1.bf16.msra.mxu1 %v2309_v45  ;;  %v141_v6 = vld [vmem:[#allocation5 + $0x170] sm:$0xff]  ;;  %v150_v18 = vld [vmem:[#allocation5 + $0x1b8] sm:$0xff] }
  0x6c   :  { %2298 = vmatpush1.bf16.msra.mxu0 %v2297_v50  ;;  %v134_v50 = vld [vmem:[#allocation5 + $0x138] sm:$0xff]  ;;  %2312 = vmatprep.subr.bf16.mxu1 %v2311_v46  ;;  %v2321_v22 = vpack.c.bf16 %v141_v6, %v137_v5  ;;  %v2323_v23 = vpack.c.bf16 %v150_v18, %v146_v17  ;;  %v145_v26 = vld [vmem:[#allocation5 + $0x190] sm:$0xff] }
  0x6d   :  { %2332 = vmatprep.subr.bf16.mxu0 %v2983_v51  ;;  %v2315_v53 = vpack.c.bf16 %v134_v50, %v130_v49  ;;  %v149_v27 = vld [vmem:[#allocation5 + $0x1b0] sm:$0xff]  ;;  %v154_v28 = vld [vmem:[#allocation5 + $0x1d8] sm:$0xff] }
  0x6e   :  { %v158_v29 = vld [vmem:[#allocation5 + $0x1f8] sm:$0xff]  ;;  %v2325_v30 = vpack.c.bf16 %v149_v27, %v145_v26  ;;  %v153_v32 = vld [vmem:[#allocation5 + $0x1d0] sm:$0xff] }
  0x6f   :  { %257 = vmatmul.mubr.f32.vlgmr.msra.gmra.mrb[0].mxu0 %v2985_v54  ;;  %2314 = vmatpush1.bf16.msra.mxu1 %v2313_v52  ;;  %v2327_v31 = vpack.c.bf16 %v158_v29, %v154_v28  ;;  %v157_v33 = vld [vmem:[#allocation5 + $0x1f0] sm:$0xff] }
  0x70   :  { %262 = vmatprep.mubr.f32.mxu0 %v2878_v0  ;;  %2334 = vmatpush3.bf16.msra.mxu0 %v2983_v51  ;;  %v2329_v34 = vpack.c.bf16 %v157_v33, %v153_v32 }
  0x71   :  { %2336 = vmatprep.subr.bf16.mxu0 %v2988_v55  ;;  %2316 = vmatprep.subr.bf16.mxu1 %v2315_v53 }
  0x73   :  { %263 = vmatmul.mubr.f32.gmra.mrb[2].mxu0 %v2992_v58  ;;  %2318 = vmatpush1.bf16.msra.mxu1 %v2317_v1 }
  0x74   :  { %268 = vmatprep.mubr.f32.mxu0 %v2878_v0  ;;  %2338 = vmatpush3.bf16.msra.mxu0 %v2988_v55 }
  0x75   :  { %2340 = vmatprep.subr.bf16.mxu0 %v2996_v59  ;;  %2320 = vmatprep.subr.bf16.mxu1 %v2319_v2 }
  0x77   :  { %269 = vmatmul.mubr.f32.gmra.mrb[4].mxu0 %v3000_v62  ;;  %2322 = vmatpush1.bf16.msra.mxu1 %v2321_v22 }
  0x78   :  { %274 = vmatprep.mubr.f32.mxu0 %v2878_v0  ;;  %2342 = vmatpush3.bf16.msra.mxu0 %v2996_v59 }
  0x79   :  { %2344 = vmatprep.subr.bf16.mxu0 %v3004_v63  ;;  %2324 = vmatprep.subr.bf16.mxu1 %v2323_v23 }
  0x7b   :  { %275 = vmatmul.mubr.f32.gmra.mrb[6].mxu0 %v3008_v3  ;;  %2326 = vmatpush1.bf16.msra.mxu1 %v2325_v30 }
  0x7c   :  { %280 = vmatprep.mubr.f32.mxu0 %v2878_v0  ;;  %2346 = vmatpush3.bf16.msra.mxu0 %v3004_v63 }
  0x7d   :  { %2348 = vmatprep.subr.bf16.mxu0 %v3012_v4  ;;  %2328 = vmatprep.subr.bf16.mxu1 %v2327_v31 }
  0x7f   :  { %281 = vmatmul.mubr.f32.gmra.mrb[8].mxu0 %v3016_v7  ;;  %2330 = vmatpush1.bf16.msra.mxu1 %v2329_v34 }
  0x80   :  { %286 = vmatprep.mubr.f32.mxu0 %v2878_v0  ;;  %2350 = vmatpush3.bf16.msra.mxu0 %v3012_v4 }
  0x81   :  { %2352 = vmatprep.subr.bf16.mxu0 %v3020_v8  ;;  %2364 = vmatprep.subr.bf16.mxu1 %v2983_v51 }
  0x82   :  { %418 = vmatmul.mubr.f32.vlgmr.msra.gmra.mrb[0].mxu1 %v2985_v54  ;;  %v3124_v54 = vld [vmem:[%s3499_s3] ss:$0 sm:$0xff] }
  0x83   :  { %287 = vmatmul.mubr.f32.gmra.mrb[10].mxu0 %v3024_v9  ;;  %2366 = vmatpush3.bf16.msra.mxu1 %v2983_v51 }
  0x84   :  { %292 = vmatprep.mubr.f32.mxu0 %v2878_v0  ;;  %2354 = vmatpush3.bf16.msra.mxu0 %v3020_v8 }
  0x85   :  { %2356 = vmatprep.subr.bf16.mxu0 %v3059_v19  ;;  %423 = vmatprep.mubr.f32.mxu1 %v2878_v0 }
  0x86   :  { %2368 = vmatprep.subr.bf16.mxu1 %v2988_v55  ;;  %424 = vmatmul.mubr.f32.gmra.mrb[2].mxu1 %v2992_v58 }
  0x87   :  { %293 = vmatmul.mubr.f32.gmra.mrb[12].mxu0 %v3030_v10  ;;  %429 = vmatprep.mubr.f32.mxu1 %v2878_v0 }
  0x88   :  { %298 = vmatprep.mubr.f32.mxu0 %v2878_v0  ;;  %2358 = vmatpush3.bf16.msra.mxu0 %v3059_v19 }
  0x89   :  { %2360 = vmatprep.subr.bf16.mxu0 %v3069_v24  ;;  %2370 = vmatpush3.bf16.msra.mxu1 %v2988_v55 }
  0x8a   :  { %2372 = vmatprep.subr.bf16.mxu1 %v2996_v59  ;;  %430 = vmatmul.mubr.f32.gmra.mrb[4].mxu1 %v3000_v62 }
  0x8b   :  { %299 = vmatmul.mubr.f32.gmra.mrb[14].mxu0 %v3035_v11  ;;  %435 = vmatprep.mubr.f32.mxu1 %v2878_v0 }
  0x8c   :  { %304 = vmatprep.mubr.f32.mxu0 %v2878_v0  ;;  %2362 = vmatpush3.bf16.msra.mxu0 %v3069_v24 }
  0x8d   :  { %2396 = vmatprep.subr.bf16.mxu0 %v2983_v51  ;;  %2374 = vmatpush3.bf16.msra.mxu1 %v2996_v59 }
  0x8e   :  { %2376 = vmatprep.subr.bf16.mxu1 %v3004_v63  ;;  %436 = vmatmul.mubr.f32.gmra.mrb[6].mxu1 %v3008_v3 }
  0x8f   :  { %305 = vmatmul.mubr.f32.gmra.mrb[16].mxu0 %v3039_v12  ;;  %441 = vmatprep.mubr.f32.mxu1 %v2878_v0 }
  0x90   :  { %310 = vmatprep.mubr.f32.mxu0 %v2878_v0 }
  0x91   :  { %2378 = vmatpush3.bf16.msra.mxu1 %v3004_v63 }
  0x92   :  { %2380 = vmatprep.subr.bf16.mxu1 %v3012_v4  ;;  %442 = vmatmul.mubr.f32.gmra.mrb[8].mxu1 %v3016_v7 }
  0x93   :  { %311 = vmatmul.mubr.f32.gmra.mrb[18].mxu0 %v3043_v13  ;;  %447 = vmatprep.mubr.f32.mxu1 %v2878_v0 }
  0x94   :  { %316 = vmatprep.mubr.f32.mxu0 %v2878_v0 }
  0x95   :  { %2382 = vmatpush3.bf16.msra.mxu1 %v3012_v4 }
  0x96   :  { %2384 = vmatprep.subr.bf16.mxu1 %v3020_v8  ;;  %448 = vmatmul.mubr.f32.gmra.mrb[10].mxu1 %v3024_v9 }
  0x97   :  { %317 = vmatmul.mubr.f32.gmra.mrb[20].mxu0 %v3047_v14  ;;  %453 = vmatprep.mubr.f32.mxu1 %v2878_v0 }
  0x98   :  { %322 = vmatprep.mubr.f32.mxu0 %v2878_v0 }
  0x99   :  { %2386 = vmatpush3.bf16.msra.mxu1 %v3020_v8 }
  0x9a   :  { %2388 = vmatprep.subr.bf16.mxu1 %v3059_v19  ;;  %454 = vmatmul.mubr.f32.gmra.mrb[12].mxu1 %v3030_v10 }
  0x9b   :  { %323 = vmatmul.mubr.f32.gmra.mrb[22].mxu0 %v3051_v15  ;;  %459 = vmatprep.mubr.f32.mxu1 %v2878_v0 }
  0x9c   :  { %328 = vmatprep.mubr.f32.mxu0 %v2878_v0 }
  0x9d   :  { %2390 = vmatpush3.bf16.msra.mxu1 %v3059_v19 }
  0x9e   :  { %2392 = vmatprep.subr.bf16.mxu1 %v3069_v24  ;;  %460 = vmatmul.mubr.f32.gmra.mrb[14].mxu1 %v3035_v11 }
  0x9f   :  { %329 = vmatmul.mubr.f32.gmra.mrb[24].mxu0 %v3055_v16  ;;  %465 = vmatprep.mubr.f32.mxu1 %v2878_v0 }
  0xa0   :  { %334 = vmatprep.mubr.f32.mxu0 %v2878_v0 }
  0xa1   :  { %2394 = vmatpush3.bf16.msra.mxu1 %v3069_v24 }
  0xa2   :  { %2428 = vmatprep.subr.bf16.mxu1 %v2983_v51  ;;  %466 = vmatmul.mubr.f32.gmra.mrb[16].mxu1 %v3039_v12 }
  0xa3   :  { %335 = vmatmul.mubr.f32.gmra.mrb[26].mxu0 %v3061_v20  ;;  %471 = vmatprep.mubr.f32.mxu1 %v2878_v0 }
  0xa4   :  { %340 = vmatprep.mubr.f32.mxu0 %v2878_v0 }
  0xa6   :  { %472 = vmatmul.mubr.f32.gmra.mrb[18].mxu1 %v3043_v13 }
  0xa7   :  { %341 = vmatmul.mubr.f32.gmra.mrb[28].mxu0 %v3067_v21  ;;  %477 = vmatprep.mubr.f32.mxu1 %v2878_v0 }
  0xa8   :  { %346 = vmatprep.mubr.f32.mxu0 %v2878_v0 }
  0xaa   :  { %478 = vmatmul.mubr.f32.gmra.mrb[20].mxu1 %v3047_v14 }
  0xab   :  { %347 = vmatmul.mubr.f32.gmra.mrb[30].mxu0 %v3075_v25  ;;  %483 = vmatprep.mubr.f32.mxu1 %v2878_v0 }
  0xae   :  { %484 = vmatmul.mubr.f32.gmra.mrb[22].mxu1 %v3051_v15 }
  0xaf   :  { %489 = vmatprep.mubr.f32.mxu1 %v2878_v0 }
  0xb2   :  { %490 = vmatmul.mubr.f32.gmra.mrb[24].mxu1 %v3055_v16 }
  0xb3   :  { %495 = vmatprep.mubr.f32.mxu1 %v2878_v0 }
  0xb6   :  { %496 = vmatmul.mubr.f32.gmra.mrb[26].mxu1 %v3061_v20 }
  0xb7   :  { %501 = vmatprep.mubr.f32.mxu1 %v2878_v0 }
  0xba   :  { %502 = vmatmul.mubr.f32.gmra.mrb[28].mxu1 %v3067_v21 }
  0xbb   :  { %507 = vmatprep.mubr.f32.mxu1 %v2878_v0 }
  0xbe   :  { %508 = vmatmul.mubr.f32.gmra.mrb[30].mxu1 %v3075_v25 }
 0x142   :  { %v258_v58 = vpop.f32.mrb[0].mxu0 }
 0x143   :  { %v520_v62 = vadd.f32 %v3124_v54, %v258_v58  ;;  %v3128_v3 = vpop.f32.mrb[1].mxu0 }
 0x145   :  { %2599 = vtanh.f32 %v520_v62 }
 0x146   :  { %v264_v7 = vpop.f32.mrb[2].mxu0 }
 0x147   :  { %v521_v9 = vadd.f32 %v3124_v54, %v264_v7  ;;  %v3133_v10 = vpop.f32.mrb[3].mxu0 }
 0x149   :  { %2601 = vtanh.f32 %v521_v9 }
 0x14a   :  { %v270_v11 = vpop.f32.mrb[4].mxu0 }
 0x14b   :  { %v522_v12 = vadd.f32 %v3124_v54, %v270_v11  ;;  %v3138_v13 = vpop.f32.mrb[5].mxu0 }
 0x14d   :  { %2603 = vtanh.f32 %v522_v12 }
 0x14e   :  { %v276_v14 = vpop.f32.mrb[6].mxu0 }
 0x14f   :  { %v2600_v15 = vpop.eup %2599  ;;  %v523_v16 = vadd.f32 %v3124_v54, %v276_v14  ;;  %v3142_v20 = vpop.f32.mrb[7].mxu0 }
 0x150   :  { %1947 = vmatprep.mubr.f32.mxu0 %v2600_v15 }
 0x151   :  { %2605 = vtanh.f32 %v523_v16 }
 0x152   :  { %v282_v21 = vpop.f32.mrb[8].mxu0 }
 0x153   :  { %v2602_v35 = vpop.eup %2601  ;;  %v524_v0 = vadd.f32 %v3124_v54, %v282_v21  ;;  %v3145_v36 = vpop.f32.mrb[9].mxu0 }
 0x154   :  { %1948 = vmatmul.mubr.f32.vlgmr.msra.gmra.mrb[32].mxu0 %v2602_v35 }
 0x155   :  { %2607 = vtanh.f32 %v524_v0  ;;  %2398 = vmatpush3.bf16.msra.mxu0 %v2983_v51  ;;  %v3204_v28 = vpop.f32.mrb[0].mxu1 }
 0x156   :  { %v288_v25 = vpop.f32.mrb[10].mxu0  ;;  %2400 = vmatprep.subr.bf16.mxu0 %v2988_v55  ;;  %v3206_v29 = vpop.f32.mrb[1].mxu1 }
 0x157   :  { %v2604_v37 = vpop.eup %2603  ;;  %v525_v38 = vadd.f32 %v3124_v54, %v288_v25  ;;  %v3150_v39 = vpop.f32.mrb[11].mxu0 }
 0x158   :  { %1950 = vmatprep.mubr.f32.mxu0 %v2604_v37 }
 0x159   :  { %2609 = vtanh.f32 %v525_v38  ;;  %2402 = vmatpush3.bf16.msra.mxu0 %v2988_v55  ;;  %v3208_v30 = vpop.f32.mrb[2].mxu1 }
 0x15a   :  { %v294_v40 = vpop.f32.mrb[12].mxu0  ;;  %2404 = vmatprep.subr.bf16.mxu0 %v2996_v59  ;;  %v3210_v31 = vpop.f32.mrb[3].mxu1 }
 0x15b   :  { %v2606_v41 = vpop.eup %2605  ;;  %v526_v42 = vadd.f32 %v3124_v54, %v294_v40  ;;  %v3155_v43 = vpop.f32.mrb[13].mxu0 }
 0x15c   :  { %1951 = vmatmul.mubr.f32.gmra.mrb[34].mxu0 %v2606_v41 }
 0x15d   :  { %2611 = vtanh.f32 %v526_v42  ;;  %2406 = vmatpush3.bf16.msra.mxu0 %v2996_v59  ;;  %v3212_v32 = vpop.f32.mrb[4].mxu1 }
 0x15e   :  { %v300_v44 = vpop.f32.mrb[14].mxu0  ;;  %2408 = vmatprep.subr.bf16.mxu0 %v3004_v63  ;;  %v3214_v33 = vpop.f32.mrb[5].mxu1 }
 0x15f   :  { %v2608_v45 = vpop.eup %2607  ;;  %v527_v46 = vadd.f32 %v3124_v54, %v300_v44  ;;  %v3160_v47 = vpop.f32.mrb[15].mxu0 }
 0x160   :  { %1953 = vmatprep.mubr.f32.mxu0 %v2608_v45 }
 0x161   :  { %2613 = vtanh.f32 %v527_v46  ;;  %2410 = vmatpush3.bf16.msra.mxu0 %v3004_v63  ;;  %v3216_v34 = vpop.f32.mrb[6].mxu1 }
 0x162   :  { %v3163_v48 = vpop.f32.mrb[16].mxu0  ;;  %2412 = vmatprep.subr.bf16.mxu0 %v3012_v4  ;;  %v3218_v58 = vpop.f32.mrb[7].mxu1 }
 0x163   :  { %v2610_v49 = vpop.eup %2609  ;;  %v3166_v50 = vpop.f32.mrb[17].mxu0 }
 0x164   :  { %1954 = vmatmul.mubr.f32.gmra.mrb[36].mxu0 %v2610_v49 }
 0x165   :  { %2414 = vmatpush3.bf16.msra.mxu0 %v3012_v4  ;;  %v3220_v62 = vpop.f32.mrb[8].mxu1 }
 0x166   :  { %v3169_v52 = vpop.f32.mrb[18].mxu0  ;;  %2416 = vmatprep.subr.bf16.mxu0 %v3020_v8  ;;  %v3222_v7 = vpop.f32.mrb[9].mxu1 }
 0x167   :  { %v2612_v53 = vpop.eup %2611  ;;  %v3172_v56 = vpop.f32.mrb[19].mxu0 }
 0x168   :  { %1956 = vmatprep.mubr.f32.mxu0 %v2612_v53 }
 0x169   :  { %2418 = vmatpush3.bf16.msra.mxu0 %v3020_v8  ;;  %v3224_v9 = vpop.f32.mrb[10].mxu1 }
 0x16a   :  { %v3175_v57 = vpop.f32.mrb[20].mxu0  ;;  %2420 = vmatprep.subr.bf16.mxu0 %v3059_v19  ;;  %v3226_v11 = vpop.f32.mrb[11].mxu1 }
 0x16b   :  { %v2614_v60 = vpop.eup %2613  ;;  %v3178_v61 = vpop.f32.mrb[21].mxu0 }
 0x16c   :  { %1957 = vmatmul.mubr.f32.gmra.mrb[38].mxu0 %v2614_v60 }
 0x16d   :  { %2422 = vmatpush3.bf16.msra.mxu0 %v3059_v19  ;;  %v3228_v12 = vpop.f32.mrb[12].mxu1 }
 0x16e   :  { %v3181_v1 = vpop.f32.mrb[22].mxu0  ;;  %2424 = vmatprep.subr.bf16.mxu0 %v3069_v24  ;;  %v3230_v14 = vpop.f32.mrb[13].mxu1 }
 0x16f   :  { %v3184_v2 = vpop.f32.mrb[23].mxu0 }
 0x171   :  { %2426 = vmatpush3.bf16.msra.mxu0 %v3069_v24  ;;  %v3232_v15 = vpop.f32.mrb[14].mxu1 }
 0x172   :  { %2460 = vmatprep.subr.bf16.mxu0 %v2983_v51  ;;  %v3188_v5 = vpop.f32.mrb[24].mxu0  ;;  %v3234_v16 = vpop.f32.mrb[15].mxu1 }
 0x173   :  { %v3190_v6 = vpop.f32.mrb[25].mxu0 }
 0x175   :  { %v3236_v21 = vpop.f32.mrb[16].mxu1 }
 0x176   :  { %v3192_v17 = vpop.f32.mrb[26].mxu0  ;;  %v3238_v35 = vpop.f32.mrb[17].mxu1 }
 0x177   :  { %v3194_v18 = vpop.f32.mrb[27].mxu0  ;;  %3503 = vst [vmem:[#allocation18_spill] sm:$0xff] %v3238_v35 }
 0x179   :  { %v3240_v0 = vpop.f32.mrb[18].mxu1 }
 0x17a   :  { %v3196_v22 = vpop.f32.mrb[28].mxu0  ;;  %v3242_v25 = vpop.f32.mrb[19].mxu1 }
 0x17b   :  { %v3198_v23 = vpop.f32.mrb[29].mxu0  ;;  %3504 = vst [vmem:[#allocation19_spill] sm:$0xff] %v3242_v25 }
 0x17d   :  { %v3244_v37 = vpop.f32.mrb[20].mxu1 }
 0x17e   :  { %v3200_v26 = vpop.f32.mrb[30].mxu0  ;;  %3505 = vst [vmem:[#allocation20_spill] sm:$0xff] %v3244_v37  ;;  %v3246_v38 = vpop.f32.mrb[21].mxu1 }
 0x17f   :  { %v3202_v27 = vpop.f32.mrb[31].mxu0  ;;  %3506 = vst [vmem:[#allocation21_spill] sm:$0xff] %v3246_v38 }
 0x181   :  { %v3248_v40 = vpop.f32.mrb[22].mxu1 }
 0x182   :  { %v3250_v41 = vpop.f32.mrb[23].mxu1 }
 0x183   :  { %3507 = vst [vmem:[#allocation22_spill] sm:$0xff] %v3250_v41 }
 0x185   :  { %v3252_v42 = vpop.f32.mrb[24].mxu1 }
 0x186   :  { %3508 = vst [vmem:[#allocation23_spill] sm:$0xff] %v3252_v42  ;;  %v3254_v44 = vpop.f32.mrb[25].mxu1 }
 0x187   :  { %3509 = vst [vmem:[#allocation24_spill] sm:$0xff] %v3254_v44 }
 0x189   :  { %v3256_v45 = vpop.f32.mrb[26].mxu1 }
 0x18a   :  { %3510 = vst [vmem:[#allocation25_spill] sm:$0xff] %v3256_v45  ;;  %v3258_v46 = vpop.f32.mrb[27].mxu1 }
 0x18b   :  { %3511 = vst [vmem:[#allocation26_spill] sm:$0xff] %v3258_v46 }
 0x18d   :  { %v3260_v49 = vpop.f32.mrb[28].mxu1 }
 0x18e   :  { %3512 = vst [vmem:[#allocation27_spill] sm:$0xff] %v3260_v49  ;;  %v3262_v53 = vpop.f32.mrb[29].mxu1 }
 0x18f   :  { %3513 = vst [vmem:[#allocation28_spill] sm:$0xff] %v3262_v53 }
 0x191   :  { %v3264_v60 = vpop.f32.mrb[30].mxu1 }
 0x192   :  { %3514 = vst [vmem:[#allocation29_spill] sm:$0xff] %v3264_v60  ;;  %v3266_v35 = vpop.f32.mrb[31].mxu1 }
 0x193   :  { %3515 = vst [vmem:[#allocation30_spill] sm:$0xff] %v3266_v35 }
 0x227   :  { %v1949_v38 = vpop.f32.mrb[32].mxu0 }
 0x228   :  { %v642_v25 = vadd.f32 %v1949_v38, %v3133_v10  ;;  %v602_v41 = vpop.f32.mrb[33].mxu0 }
 0x229   :  { %v641_v42 = vadd.f32 %v602_v41, %v3128_v3 }
 0x22a   :  { %v650_v44 = vadd.f32 %v3124_v54, %v642_v25 }
 0x22b   :  { %v649_v45 = vadd.f32 %v3124_v54, %v641_v42 }
 0x22d   :  { %2615 = vtanh.f32 %v649_v45 }
 0x22e   :  { %2617 = vtanh.f32 %v650_v44 }
 0x22f   :  { %v1952_v46 = vpop.f32.mrb[34].mxu0 }
 0x230   :  { %v644_v49 = vadd.f32 %v1952_v46, %v3142_v20  ;;  %v612_v53 = vpop.f32.mrb[35].mxu0 }
 0x231   :  { %v643_v60 = vadd.f32 %v612_v53, %v3138_v13 }
 0x232   :  { %v652_v35 = vadd.f32 %v3124_v54, %v644_v49  ;;  %v923_v49 = vadd.f32 %v3124_v54, %v3163_v48  ;;  %v925_v48 = vadd.f32 %v3124_v54, %v3175_v57  ;;  %v928_v57 = vadd.f32 %v3124_v54, %v3192_v17 }
 0x233   :  { %v651_v37 = vadd.f32 %v3124_v54, %v643_v60  ;;  %v924_v60 = vadd.f32 %v3124_v54, %v3169_v52 }
 0x235   :  { %2619 = vtanh.f32 %v651_v37 }
 0x236   :  { %2621 = vtanh.f32 %v652_v35 }
 0x237   :  { %v2616_v10 = vpop.eup %2615  ;;  %v1955_v3 = vpop.f32.mrb[36].mxu0 }
 0x238   :  { %v2618_v38 = vpop.eup %2617  ;;  %v646_v25 = vadd.f32 %v1955_v3, %v3150_v39  ;;  %v622_v41 = vpop.f32.mrb[37].mxu0  ;;  %1991 = vmatprep.mubr.f32.mxu1 %v2616_v10  ;;  %v926_v10 = vadd.f32 %v3124_v54, %v3181_v1  ;;  %v929_v1 = vadd.f32 %v3124_v54, %v3196_v22 }
 0x239   :  { %v645_v42 = vadd.f32 %v622_v41, %v3145_v36  ;;  %1992 = vmatmul.mubr.f32.vlgmr.msra.gmra.mrb[32].mxu1 %v2618_v38  ;;  %v927_v38 = vadd.f32 %v3124_v54, %v3188_v5  ;;  %v930_v5 = vadd.f32 %v3124_v54, %v3200_v26 }
 0x23a   :  { %v654_v20 = vadd.f32 %v3124_v54, %v646_v25  ;;  %2430 = vmatpush3.bf16.msra.mxu1 %v2983_v51 }
 0x23b   :  { %v653_v13 = vadd.f32 %v3124_v54, %v645_v42  ;;  %2432 = vmatprep.subr.bf16.mxu1 %v2988_v55 }
 0x23d   :  { %2623 = vtanh.f32 %v653_v13 }
 0x23e   :  { %2625 = vtanh.f32 %v654_v20  ;;  %2434 = vmatpush3.bf16.msra.mxu1 %v2988_v55 }
 0x23f   :  { %v2620_v35 = vpop.eup %2619  ;;  %v1958_v37 = vpop.f32.mrb[38].mxu0  ;;  %2436 = vmatprep.subr.bf16.mxu1 %v2996_v59 }
 0x240   :  { %v2622_v39 = vpop.eup %2621  ;;  %v648_v36 = vadd.f32 %v1958_v37, %v3160_v47  ;;  %v632_v44 = vpop.f32.mrb[39].mxu0  ;;  %1994 = vmatprep.mubr.f32.mxu1 %v2620_v35  ;;  %v175_v35 = vld [vmem:[#allocation8] sm:$0xff]  ;;  %v176_v37 = vld [vmem:[#allocation8 + $0x8] sm:$0xff] }
 0x241   :  { %v647_v45 = vadd.f32 %v632_v44, %v3155_v43  ;;  %1995 = vmatmul.mubr.f32.gmra.mrb[34].mxu1 %v2622_v39  ;;  %v3331_v39 = vpack.c.bf16 %v176_v37, %v175_v35 }
 0x242   :  { %v656_v46 = vadd.f32 %v3124_v54, %v648_v36  ;;  %2438 = vmatpush3.bf16.msra.mxu1 %v2996_v59 }
 0x243   :  { %v655_v53 = vadd.f32 %v3124_v54, %v647_v45  ;;  %2440 = vmatprep.subr.bf16.mxu1 %v3004_v63 }
 0x245   :  { %2627 = vtanh.f32 %v655_v53 }
 0x246   :  { %2629 = vtanh.f32 %v656_v46  ;;  %2442 = vmatpush3.bf16.msra.mxu1 %v3004_v63 }
 0x247   :  { %v2624_v47 = vpop.eup %2623  ;;  %2631 = vtanh.f32 %v923_v49  ;;  %2444 = vmatprep.subr.bf16.mxu1 %v3012_v4 }
 0x248   :  { %v2626_v43 = vpop.eup %2625  ;;  %1997 = vmatprep.mubr.f32.mxu1 %v2624_v47  ;;  %2633 = vtanh.f32 %v924_v60 }
 0x249   :  { %1998 = vmatmul.mubr.f32.gmra.mrb[36].mxu1 %v2626_v43  ;;  %2635 = vtanh.f32 %v925_v48 }
 0x24a   :  { %2446 = vmatpush3.bf16.msra.mxu1 %v3012_v4  ;;  %2637 = vtanh.f32 %v926_v10 }
 0x24b   :  { %2448 = vmatprep.subr.bf16.mxu1 %v3020_v8  ;;  %2639 = vtanh.f32 %v927_v38 }
 0x24c   :  { %2641 = vtanh.f32 %v928_v57 }
 0x24d   :  { %2643 = vtanh.f32 %v929_v1 }
 0x24e   :  { %2450 = vmatpush3.bf16.msra.mxu1 %v3020_v8  ;;  %2645 = vtanh.f32 %v930_v5 }
 0x24f   :  { %v2628_v3 = vpop.eup %2627  ;;  %2452 = vmatprep.subr.bf16.mxu1 %v3059_v19 }
 0x250   :  { %v2630_v52 = vpop.eup %2629  ;;  %2000 = vmatprep.mubr.f32.mxu1 %v2628_v3 }
 0x251   :  { %v2632_v25 = vpop.eup %2631  ;;  %2001 = vmatmul.mubr.f32.gmra.mrb[38].mxu1 %v2630_v52 }
 0x252   :  { %2454 = vmatpush3.bf16.msra.mxu1 %v3059_v19  ;;  %2079 = vmatprep.mubr.f32.mxu1 %v2632_v25  ;;  %v2634_v41 = vpop.eup %2633 }
 0x253   :  { %2456 = vmatprep.subr.bf16.mxu1 %v3069_v24  ;;  %v2636_v17 = vpop.eup %2635 }
 0x254   :  { %v2638_v22 = vpop.eup %2637 }
 0x255   :  { %v2640_v42 = vpop.eup %2639 }
 0x256   :  { %2458 = vmatpush3.bf16.msra.mxu1 %v3069_v24  ;;  %v2642_v26 = vpop.eup %2641 }
 0x257   :  { %2492 = vmatprep.subr.bf16.mxu1 %v2983_v51  ;;  %v2644_v20 = vpop.eup %2643 }
 0x258   :  { %v2646_v13 = vpop.eup %2645 }
 0x259   :  { %2080 = vmatmul.mubr.f32.vlgmr.msra.gmra.mrb[40].mxu1 %v2634_v41 }
 0x25a   :  { %2082 = vmatprep.mubr.f32.mxu1 %v2636_v17  ;;  %2494 = vmatpush3.bf16.msra.mxu1 %v2983_v51 }
 0x25b   :  { %2496 = vmatprep.subr.bf16.mxu1 %v2988_v55 }
 0x25d   :  { %2083 = vmatmul.mubr.f32.gmra.mrb[42].mxu1 %v2638_v22 }
 0x25e   :  { %2085 = vmatprep.mubr.f32.mxu1 %v2640_v42  ;;  %2498 = vmatpush3.bf16.msra.mxu1 %v2988_v55 }
 0x25f   :  { %2500 = vmatprep.subr.bf16.mxu1 %v2996_v59 }
 0x261   :  { %2086 = vmatmul.mubr.f32.gmra.mrb[44].mxu1 %v2642_v26 }
 0x262   :  { %2088 = vmatprep.mubr.f32.mxu1 %v2644_v20  ;;  %2502 = vmatpush3.bf16.msra.mxu1 %v2996_v59 }
 0x263   :  { %2504 = vmatprep.subr.bf16.mxu1 %v3004_v63 }
 0x265   :  { %2089 = vmatmul.mubr.f32.gmra.mrb[46].mxu1 %v2646_v13 }
 0x266   :  { %2506 = vmatpush3.bf16.msra.mxu1 %v3004_v63 }
 0x267   :  { %2508 = vmatprep.subr.bf16.mxu1 %v3012_v4 }
 0x26a   :  { %2510 = vmatpush3.bf16.msra.mxu1 %v3012_v4 }
 0x26b   :  { %2512 = vmatprep.subr.bf16.mxu1 %v3020_v8 }
 0x26e   :  { %2514 = vmatpush3.bf16.msra.mxu1 %v3020_v8 }
 0x26f   :  { %2516 = vmatprep.subr.bf16.mxu1 %v3059_v19 }
 0x272   :  { %2518 = vmatpush3.bf16.msra.mxu1 %v3059_v19 }
 0x273   :  { %2520 = vmatprep.subr.bf16.mxu1 %v3069_v24 }
 0x276   :  { %2522 = vmatpush3.bf16.msra.mxu1 %v3069_v24 }
 0x277   :  { %2556 = vmatprep.subr.bf16.mxu1 %v3331_v39 }
 0x30c   :  { %v1993_v36 = vpop.f32.mrb[32].mxu1 }
 0x30d   :  { %v771_v44 = vadd.f32 %v1993_v36, %v3208_v30  ;;  %v731_v45 = vpop.f32.mrb[33].mxu1 }
 0x30e   :  { %v770_v46 = vadd.f32 %v731_v45, %v3204_v28 }
 0x30f   :  { %v779_v49 = vadd.f32 %v3124_v54, %v771_v44 }
 0x310   :  { %v778_v53 = vadd.f32 %v3124_v54, %v770_v46 }
 0x312   :  { %2647 = vtanh.f32 %v778_v53 }
 0x313   :  { %2649 = vtanh.f32 %v779_v49 }
 0x314   :  { %v1996_v47 = vpop.f32.mrb[34].mxu1 }
 0x315   :  { %v773_v43 = vadd.f32 %v1996_v47, %v3216_v34  ;;  %v741_v60 = vpop.f32.mrb[35].mxu1 }
 0x316   :  { %v772_v48 = vadd.f32 %v741_v60, %v3212_v32  ;;  %v178_v60 = vld [vmem:[#allocation8 + $0x18] sm:$0xff] }
 0x317   :  { %v781_v10 = vadd.f32 %v3124_v54, %v773_v43 }
 0x318   :  { %v780_v3 = vadd.f32 %v3124_v54, %v772_v48 }
 0x31a   :  { %2651 = vtanh.f32 %v780_v3 }
 0x31b   :  { %2653 = vtanh.f32 %v781_v10 }
 0x31c   :  { %v2648_v30 = vpop.eup %2647  ;;  %v1999_v28 = vpop.f32.mrb[36].mxu1 }
 0x31d   :  { %v2650_v38 = vpop.eup %2649  ;;  %v775_v52 = vadd.f32 %v1999_v28, %v3224_v9  ;;  %v751_v25 = vpop.f32.mrb[37].mxu1  ;;  %2035 = vmatprep.mubr.f32.mxu0 %v2648_v30  ;;  %v180_v28 = vld [vmem:[#allocation8 + $0x28] sm:$0xff] }
 0x31e   :  { %v774_v57 = vadd.f32 %v751_v25, %v3220_v62  ;;  %2036 = vmatmul.mubr.f32.vlgmr.msra.gmra.mrb[40].mxu0 %v2650_v38  ;;  %v182_v25 = vld [vmem:[#allocation8 + $0x38] sm:$0xff] }
 0x31f   :  { %v783_v34 = vadd.f32 %v3124_v54, %v775_v52  ;;  %2462 = vmatpush3.bf16.msra.mxu0 %v2983_v51  ;;  %v181_v52 = vld [vmem:[#allocation8 + $0x30] sm:$0xff] }
 0x320   :  { %v782_v32 = vadd.f32 %v3124_v54, %v774_v57  ;;  %2464 = vmatprep.subr.bf16.mxu0 %v2988_v55 }
 0x322   :  { %2655 = vtanh.f32 %v782_v32 }
 0x323   :  { %2657 = vtanh.f32 %v783_v34  ;;  %2466 = vmatpush3.bf16.msra.mxu0 %v2988_v55  ;;  %v3390_v34 = vpack.c.bf16 %v182_v25, %v181_v52  ;;  %v3516_v25 = vld [vmem:[#allocation20_spill] sm:$0xff] }
 0x324   :  { %v2652_v1 = vpop.eup %2651  ;;  %v2002_v5 = vpop.f32.mrb[38].mxu1  ;;  %2468 = vmatprep.subr.bf16.mxu0 %v2996_v59 }
 0x325   :  { %v2654_v9 = vpop.eup %2653  ;;  %v777_v62 = vadd.f32 %v2002_v5, %v3232_v15  ;;  %v761_v41 = vpop.f32.mrb[39].mxu1  ;;  %2038 = vmatprep.mubr.f32.mxu0 %v2652_v1 }
 0x326   :  { %v776_v17 = vadd.f32 %v761_v41, %v3228_v12  ;;  %2039 = vmatmul.mubr.f32.gmra.mrb[42].mxu0 %v2654_v9  ;;  %v183_v9 = vld [vmem:[#allocation8 + $0x40] sm:$0xff] }
 0x327   :  { %v785_v51 = vadd.f32 %v3124_v54, %v777_v62  ;;  %2470 = vmatpush3.bf16.msra.mxu0 %v2996_v59  ;;  %v184_v62 = vld [vmem:[#allocation8 + $0x48] sm:$0xff] }
 0x328   :  { %v784_v22 = vadd.f32 %v3124_v54, %v776_v17  ;;  %2472 = vmatprep.subr.bf16.mxu0 %v3004_v63  ;;  %v3395_v41 = vpack.c.bf16 %v184_v62, %v183_v9  ;;  %v185_v17 = vld [vmem:[#allocation8 + $0x50] sm:$0xff]  ;;  %v3517_v9 = vld [vmem:[#allocation25_spill] sm:$0xff] }
 0x32a   :  { %2659 = vtanh.f32 %v784_v22 }
 0x32b   :  { %2661 = vtanh.f32 %v785_v51  ;;  %2474 = vmatpush3.bf16.msra.mxu0 %v3004_v63  ;;  %v186_v51 = vld [vmem:[#allocation8 + $0x58] sm:$0xff] }
 0x32c   :  { %v2656_v55 = vpop.eup %2655  ;;  %v2081_v42 = vpop.f32.mrb[40].mxu1  ;;  %2476 = vmatprep.subr.bf16.mxu0 %v3012_v4  ;;  %v3399_v22 = vpack.c.bf16 %v186_v51, %v185_v17 }
 0x32d   :  { %v2658_v15 = vpop.eup %2657  ;;  %v1045_v12 = vadd.f32 %v2081_v42, %v3172_v56  ;;  %v1005_v26 = vpop.f32.mrb[41].mxu1  ;;  %2041 = vmatprep.mubr.f32.mxu0 %v2656_v55  ;;  %v187_v55 = vld [vmem:[#allocation8 + $0x60] sm:$0xff]  ;;  %v188_v42 = vld [vmem:[#allocation8 + $0x68] sm:$0xff] }
 0x32e   :  { %v1044_v20 = vadd.f32 %v1005_v26, %v3166_v50  ;;  %2042 = vmatmul.mubr.f32.gmra.mrb[44].mxu0 %v2658_v15  ;;  %v3403_v15 = vpack.c.bf16 %v188_v42, %v187_v55  ;;  %v190_v26 = vld [vmem:[#allocation8 + $0x78] sm:$0xff] }
 0x32f   :  { %v1053_v59 = vadd.f32 %v3124_v54, %v1045_v12  ;;  %2478 = vmatpush3.bf16.msra.mxu0 %v3012_v4  ;;  %v189_v12 = vld [vmem:[#allocation8 + $0x70] sm:$0xff] }
 0x330   :  { %v1052_v13 = vadd.f32 %v3124_v54, %v1044_v20  ;;  %v2084_v35 = vpop.f32.mrb[42].mxu1  ;;  %2480 = vmatprep.subr.bf16.mxu0 %v3020_v8  ;;  %v3407_v20 = vpack.c.bf16 %v190_v26, %v189_v12  ;;  %v3519_v26 = vld [vmem:[#allocation29_spill] sm:$0xff] }
 0x331   :  { %v1047_v63 = vadd.f32 %v2084_v35, %v3184_v2  ;;  %v1015_v37 = vpop.f32.mrb[43].mxu1 }
 0x332   :  { %2663 = vtanh.f32 %v1052_v13  ;;  %v1046_v56 = vadd.f32 %v1015_v37, %v3178_v61 }
 0x333   :  { %2665 = vtanh.f32 %v1053_v59  ;;  %v1055_v36 = vadd.f32 %v3124_v54, %v1047_v63  ;;  %2482 = vmatpush3.bf16.msra.mxu0 %v3020_v8 }
 0x334   :  { %v2660_v50 = vpop.eup %2659  ;;  %v1054_v44 = vadd.f32 %v3124_v54, %v1046_v56  ;;  %v2087_v4 = vpop.f32.mrb[44].mxu1  ;;  %2484 = vmatprep.subr.bf16.mxu0 %v3059_v19 }
 0x335   :  { %v2662_v45 = vpop.eup %2661  ;;  %v1049_v46 = vadd.f32 %v2087_v4, %v3194_v18  ;;  %v1025_v49 = vpop.f32.mrb[45].mxu1  ;;  %2044 = vmatprep.mubr.f32.mxu0 %v2660_v50  ;;  %v177_v18 = vld [vmem:[#allocation8 + $0x10] sm:$0xff] }
 0x336   :  { %2667 = vtanh.f32 %v1054_v44  ;;  %v1048_v2 = vadd.f32 %v1025_v49, %v3190_v6  ;;  %2045 = vmatmul.mubr.f32.gmra.mrb[46].mxu0 %v2662_v45  ;;  %v3382_v3 = vpack.c.bf16 %v178_v60, %v177_v18 }
 0x337   :  { %2669 = vtanh.f32 %v1055_v36  ;;  %v1057_v61 = vadd.f32 %v3124_v54, %v1049_v46  ;;  %2486 = vmatpush3.bf16.msra.mxu0 %v3059_v19 }
 0x338   :  { %v1056_v8 = vadd.f32 %v3124_v54, %v1048_v2  ;;  %v2090_v53 = vpop.f32.mrb[46].mxu1  ;;  %2488 = vmatprep.subr.bf16.mxu0 %v3069_v24 }
 0x339   :  { %v1051_v47 = vadd.f32 %v2090_v53, %v3202_v27  ;;  %v1035_v43 = vpop.f32.mrb[47].mxu1  ;;  %v179_v27 = vld [vmem:[#allocation8 + $0x20] sm:$0xff] }
 0x33a   :  { %2671 = vtanh.f32 %v1056_v8  ;;  %v1050_v48 = vadd.f32 %v1035_v43, %v3198_v23 }
 0x33b   :  { %2673 = vtanh.f32 %v1057_v61  ;;  %v1059_v6 = vadd.f32 %v3124_v54, %v1051_v47  ;;  %2490 = vmatpush3.bf16.msra.mxu0 %v3069_v24  ;;  %v3386_v24 = vpack.c.bf16 %v180_v28, %v179_v27 }
 0x33c   :  { %v2664_v10 = vpop.eup %2663  ;;  %v1058_v19 = vadd.f32 %v3124_v54, %v1050_v48  ;;  %2524 = vmatprep.subr.bf16.mxu0 %v3331_v39 }
 0x33d   :  { %v2666_v30 = vpop.eup %2665  ;;  %2123 = vmatprep.mubr.f32.mxu0 %v2664_v10 }
 0x33e   :  { %2675 = vtanh.f32 %v1058_v19  ;;  %2124 = vmatmul.mubr.f32.vlgmr.msra.gmra.mrb[48].mxu0 %v2666_v30 }
 0x33f   :  { %2677 = vtanh.f32 %v1059_v6  ;;  %2526 = vmatpush3.bf16.msra.mxu0 %v3331_v39 }
 0x340   :  { %v2668_v23 = vpop.eup %2667  ;;  %2528 = vmatprep.subr.bf16.mxu0 %v3382_v3 }
 0x341   :  { %v2670_v38 = vpop.eup %2669  ;;  %2126 = vmatprep.mubr.f32.mxu0 %v2668_v23 }
 0x342   :  { %2127 = vmatmul.mubr.f32.gmra.mrb[50].mxu0 %v2670_v38 }
 0x343   :  { %2530 = vmatpush3.bf16.msra.mxu0 %v3382_v3 }
 0x344   :  { %v2672_v57 = vpop.eup %2671  ;;  %2532 = vmatprep.subr.bf16.mxu0 %v3386_v24 }
 0x345   :  { %v2674_v32 = vpop.eup %2673  ;;  %2129 = vmatprep.mubr.f32.mxu0 %v2672_v57 }
 0x346   :  { %2130 = vmatmul.mubr.f32.gmra.mrb[52].mxu0 %v2674_v32 }
 0x347   :  { %2534 = vmatpush3.bf16.msra.mxu0 %v3386_v24 }
 0x348   :  { %v2676_v1 = vpop.eup %2675  ;;  %2536 = vmatprep.subr.bf16.mxu0 %v3390_v34 }
 0x349   :  { %v2678_v5 = vpop.eup %2677  ;;  %2132 = vmatprep.mubr.f32.mxu0 %v2676_v1 }
 0x34a   :  { %2133 = vmatmul.mubr.f32.gmra.mrb[54].mxu0 %v2678_v5 }
 0x34b   :  { %2538 = vmatpush3.bf16.msra.mxu0 %v3390_v34 }
 0x34c   :  { %2540 = vmatprep.subr.bf16.mxu0 %v3395_v41 }
 0x34f   :  { %2542 = vmatpush3.bf16.msra.mxu0 %v3395_v41 }
 0x350   :  { %2544 = vmatprep.subr.bf16.mxu0 %v3399_v22 }
 0x353   :  { %2546 = vmatpush3.bf16.msra.mxu0 %v3399_v22 }
 0x354   :  { %2548 = vmatprep.subr.bf16.mxu0 %v3403_v15 }
 0x357   :  { %2550 = vmatpush3.bf16.msra.mxu0 %v3403_v15 }
 0x358   :  { %2552 = vmatprep.subr.bf16.mxu0 %v3407_v20 }
 0x35b   :  { %2554 = vmatpush3.bf16.msra.mxu0 %v3407_v20 }
 0x3f1   :  { %v2037_v59 = vpop.f32.mrb[40].mxu0 }
 0x3f2   :  { %v900_v13 = vadd.f32 %v2037_v59, %v3210_v31  ;;  %v860_v35 = vpop.f32.mrb[41].mxu0 }
 0x3f3   :  { %v899_v63 = vadd.f32 %v860_v35, %v3206_v29  ;;  %v3520_v35 = vld [vmem:[#allocation27_spill] sm:$0xff] }
 0x3f4   :  { %v908_v37 = vadd.f32 %v3124_v54, %v900_v13 }
 0x3f5   :  { %v907_v56 = vadd.f32 %v3124_v54, %v899_v63 }
 0x3f6   :  { %2679 = vtanh.f32 %v908_v37 }
 0x3f7   :  { %2681 = vtanh.f32 %v907_v56 }
 0x3f9   :  { %v2040_v36 = vpop.f32.mrb[42].mxu0 }
 0x3fa   :  { %v902_v50 = vadd.f32 %v2040_v36, %v3218_v58  ;;  %v870_v44 = vpop.f32.mrb[43].mxu0 }
 0x3fb   :  { %v901_v4 = vadd.f32 %v870_v44, %v3214_v33 }
 0x3fc   :  { %v910_v45 = vadd.f32 %v3124_v54, %v902_v50 }
 0x3fd   :  { %v909_v46 = vadd.f32 %v3124_v54, %v901_v4 }
 0x3fe   :  { %2683 = vtanh.f32 %v910_v45 }
 0x3ff   :  { %2685 = vtanh.f32 %v909_v46 }
 0x400   :  { %v2680_v31 = vpop.eup %2679 }
 0x401   :  { %v2682_v29 = vpop.eup %2681  ;;  %1327 = vst [vmem:[#allocation10 + $0x8] sm:$0xff] %v2680_v31  ;;  %v2043_v49 = vpop.f32.mrb[44].mxu0 }
 0x402   :  { %1326 = vst [vmem:[#allocation10] sm:$0xff] %v2682_v29  ;;  %v904_v2 = vadd.f32 %v2043_v49, %v3226_v11  ;;  %v880_v61 = vpop.f32.mrb[45].mxu0  ;;  %2211 = vmatprep.mubr.f32.mxu0 %v2682_v29 }
 0x403   :  { %v903_v58 = vadd.f32 %v880_v61, %v3222_v7  ;;  %2212 = vmatmul.mubr.f32.vlgmr.msra.gmra.mrb[56].mxu0 %v2680_v31 }
 0x404   :  { %v912_v33 = vadd.f32 %v3124_v54, %v904_v2 }
 0x405   :  { %v911_v8 = vadd.f32 %v3124_v54, %v903_v58 }
 0x406   :  { %2687 = vtanh.f32 %v912_v33 }
 0x407   :  { %2689 = vtanh.f32 %v911_v8 }
 0x408   :  { %v2684_v53 = vpop.eup %2683 }
 0x409   :  { %v2686_v47 = vpop.eup %2685  ;;  %1329 = vst [vmem:[#allocation10 + $0x18] sm:$0xff] %v2684_v53  ;;  %v2046_v43 = vpop.f32.mrb[46].mxu0 }
 0x40a   :  { %1328 = vst [vmem:[#allocation10 + $0x10] sm:$0xff] %v2686_v47  ;;  %v906_v18 = vadd.f32 %v2046_v43, %v3234_v16  ;;  %v890_v60 = vpop.f32.mrb[47].mxu0  ;;  %2214 = vmatprep.mubr.f32.mxu0 %v2686_v47 }
 0x40b   :  { %v905_v11 = vadd.f32 %v890_v60, %v3230_v14  ;;  %2215 = vmatmul.mubr.f32.gmra.mrb[58].mxu0 %v2684_v53 }
 0x40c   :  { %v914_v7 = vadd.f32 %v3124_v54, %v906_v18 }
 0x40d   :  { %v913_v48 = vadd.f32 %v3124_v54, %v905_v11 }
 0x40e   :  { %2691 = vtanh.f32 %v914_v7 }
 0x40f   :  { %2693 = vtanh.f32 %v913_v48 }
 0x410   :  { %v2688_v6 = vpop.eup %2687 }
 0x411   :  { %v2690_v10 = vpop.eup %2689  ;;  %1331 = vst [vmem:[#allocation10 + $0x28] sm:$0xff] %v2688_v6  ;;  %v2125_v19 = vpop.f32.mrb[48].mxu0 }
 0x412   :  { %1330 = vst [vmem:[#allocation10 + $0x20] sm:$0xff] %v2690_v10  ;;  %v1174_v30 = vadd.f32 %v2125_v19, %v3240_v0  ;;  %v1134_v27 = vpop.f32.mrb[49].mxu0  ;;  %2217 = vmatprep.mubr.f32.mxu0 %v2690_v10 }
 0x413   :  { %v1173_v16 = vadd.f32 %v1134_v27, %v3236_v21  ;;  %2218 = vmatmul.mubr.f32.gmra.mrb[60].mxu0 %v2688_v6 }
 0x414   :  { %v1182_v14 = vadd.f32 %v3124_v54, %v1174_v30 }
 0x415   :  { %v1181_v28 = vadd.f32 %v3124_v54, %v1173_v16  ;;  %v2128_v23 = vpop.f32.mrb[50].mxu0 }
 0x416   :  { %v1176_v38 = vadd.f32 %v2128_v23, %v3248_v40  ;;  %v1144_v52 = vpop.f32.mrb[51].mxu0  ;;  %v3518_v40 = vld [vmem:[#allocation23_spill] sm:$0xff] }
 0x417   :  { %2695 = vtanh.f32 %v1181_v28  ;;  %v1175_v57 = vadd.f32 %v1144_v52, %v3516_v25 }
 0x418   :  { %v2692_v32 = vpop.eup %2691  ;;  %2697 = vtanh.f32 %v1182_v14  ;;  %v1184_v0 = vadd.f32 %v3124_v54, %v1176_v38 }
 0x419   :  { %v2694_v1 = vpop.eup %2693  ;;  %1333 = vst [vmem:[#allocation10 + $0x38] sm:$0xff] %v2692_v32  ;;  %v1183_v21 = vadd.f32 %v3124_v54, %v1175_v57  ;;  %v2131_v5 = vpop.f32.mrb[52].mxu0 }
 0x41a   :  { %1332 = vst [vmem:[#allocation10 + $0x30] sm:$0xff] %v2694_v1  ;;  %v1178_v62 = vadd.f32 %v2131_v5, %v3517_v9  ;;  %v1154_v17 = vpop.f32.mrb[53].mxu0  ;;  %2220 = vmatprep.mubr.f32.mxu0 %v2694_v1  ;;  %v3521_v1 = vld [vmem:[#allocation19_spill] sm:$0xff]  ;;  %v3522_v9 = vld [vmem:[#allocation18_spill] sm:$0xff] }
 0x41b   :  { %2699 = vtanh.f32 %v1183_v21  ;;  %v1177_v51 = vadd.f32 %v1154_v17, %v3518_v40  ;;  %2221 = vmatmul.mubr.f32.gmra.mrb[62].mxu0 %v2692_v32  ;;  %v2727_v17 = vld [vmem:[%s3499_s3] ss:$0 sm:$0xff]  ;;  %s2880_s3 = smov [#allocation10]  }
 0x41c   :  { %2701 = vtanh.f32 %v1184_v0  ;;  %v1186_v55 = vadd.f32 %v3124_v54, %v1178_v62  ;;  %s1694_s26 = sshll.u32 %s2880_s3, 4  ;;  %s1695_s26 = int_to_ptr.vmem [resolvable:$true] %s1694_s26 }
 0x41d   :  { %v1185_v42 = vadd.f32 %v3124_v54, %v1177_v51  ;;  %v2134_v12 = vpop.f32.mrb[54].mxu0  ;;  %s2816_s29 = scalar_lea.vmem %s1695_s26, 2048  ;;  %p2821_p5 = scmp.lt.s32.totalorder %s1695_s26, %s1695_s26 }
 0x41e   :  { %v1180_v59 = vadd.f32 %v2134_v12, %v3519_v26  ;;  %v1164_v13 = vpop.f32.mrb[55].mxu0  ;;  %p2817_p4 = scmp.ne.s32.totalorder %s1695_s26, %s2816_s29  ;;  %p2822_p6 = scmp.lt.s32.totalorder %s2816_s29, %s2816_s29 }
 0x41f   :  { %2703 = vtanh.f32 %v1185_v42  ;;  %v1179_v63 = vadd.f32 %v1164_v13, %v3520_v35  ;;  %v3523_v42 = vld [vmem:[#allocation22_spill] sm:$0xff] }
 0x420   :  { %2705 = vtanh.f32 %v1186_v55  ;;  %v1188_v37 = vadd.f32 %v3124_v54, %v1180_v59  ;;  %v3524_v59 = vld [vmem:[#allocation21_spill] sm:$0xff]  ;;  %p2823_p7 = por %p2822_p6, %p2821_p5 }
 0x421   :  { %v2696_v56 = vpop.eup %2695  ;;  %v1187_v36 = vadd.f32 %v3124_v54, %v1179_v63 }
 0x422   :  { %v2698_v50 = vpop.eup %2697  ;;  %2167 = vmatprep.mubr.f32.mxu1 %v2696_v56  ;;  %v3525_v56 = vld [vmem:[#allocation26_spill] sm:$0xff]  ;;  %p2824_p8 = pnand %p2823_p7, %p2817_p4 }
 0x423   :  { %2707 = vtanh.f32 %v1187_v36  ;;  %2168 = vmatmul.mubr.f32.vlgmr.msra.gmra.mrb[48].mxu1 %v2698_v50 }
 0x424   :  { %2709 = vtanh.f32 %v1188_v37  ;;  %2558 = vmatpush3.bf16.msra.mxu1 %v3331_v39 }
 0x425   :  { %v2700_v44 = vpop.eup %2699  ;;  %2560 = vmatprep.subr.bf16.mxu1 %v3382_v3 }
 0x426   :  { %v2702_v4 = vpop.eup %2701  ;;  %2170 = vmatprep.mubr.f32.mxu1 %v2700_v44  ;;  %v3526_v44 = vld [vmem:[#allocation24_spill] sm:$0xff] }
 0x427   :  { %2171 = vmatmul.mubr.f32.gmra.mrb[50].mxu1 %v2702_v4 }
 0x428   :  { %2562 = vmatpush3.bf16.msra.mxu1 %v3382_v3 }
 0x429   :  { %v2704_v45 = vpop.eup %2703  ;;  %2564 = vmatprep.subr.bf16.mxu1 %v3386_v24 }
 0x42a   :  { %v2706_v46 = vpop.eup %2705  ;;  %2173 = vmatprep.mubr.f32.mxu1 %v2704_v45 }
 0x42b   :  { %2174 = vmatmul.mubr.f32.gmra.mrb[52].mxu1 %v2706_v46 }
 0x42c   :  { %2566 = vmatpush3.bf16.msra.mxu1 %v3386_v24 }
 0x42d   :  { %v2708_v54 = vpop.eup %2707  ;;  %2568 = vmatprep.subr.bf16.mxu1 %v3390_v34 }
 0x42e   :  { %v2710_v39 = vpop.eup %2709  ;;  %2176 = vmatprep.mubr.f32.mxu1 %v2708_v54 }
 0x42f   :  { %2177 = vmatmul.mubr.f32.gmra.mrb[54].mxu1 %v2710_v39  ;;  %v3527_v39 = vld [vmem:[#allocation30_spill] sm:$0xff] }
 0x430   :  { %2570 = vmatpush3.bf16.msra.mxu1 %v3390_v34 }
 0x431   :  { %2572 = vmatprep.subr.bf16.mxu1 %v3395_v41 }
 0x434   :  { %2574 = vmatpush3.bf16.msra.mxu1 %v3395_v41 }
 0x435   :  { %2576 = vmatprep.subr.bf16.mxu1 %v3399_v22 }
 0x438   :  { %2578 = vmatpush3.bf16.msra.mxu1 %v3399_v22  ;;  %v2879_v22 = vmov -1e+30  }
 0x439   :  { %2580 = vmatprep.subr.bf16.mxu1 %v3403_v15  ;;  %v1681_v58 = vrot.slane %v2879_v22, 4 }
 0x43b   :  { %v1682_v47 = vmax.f32 %v1681_v58, -1e+30 }
 0x43c   :  { %2582 = vmatpush3.bf16.msra.mxu1 %v3403_v15 }
 0x43d   :  { %2584 = vmatprep.subr.bf16.mxu1 %v3407_v20  ;;  %v1683_v7 = vrot.slane %v1682_v47, 2 }
 0x43f   :  { %v1684_v30 = vmax.f32 %v1682_v47, %v1683_v7 }
 0x440   :  { %2586 = vmatpush3.bf16.msra.mxu1 %v3407_v20 }
 0x441   :  { %v1685_v14 = vrot.slane %v1684_v30, 1 }
 0x443   :  { %v1686_v25 = vmax.f32 %v1684_v30, %v1685_v14 }
 0x4d6   :  { %v2213_v3 = vpop.f32.mrb[56].mxu0 }
 0x4d7   :  { %vm1449_vm0 = vcmp.gt.f32.partialorder %v2213_v3, 0.0  ;;  %v1457_v24 = vmul.f32 0.01, %v2213_v3  ;;  %v1409_v34 = vpop.f32.mrb[57].mxu0 }
 0x4d8   :  { %vm1448_vm1 = vcmp.gt.f32.partialorder %v1409_v34, 0.0  ;;  %v1456_v31 = vmul.f32 0.01, %v1409_v34 }
 0x4d9   :  { %v1465_v29 = vsel %vm1449_vm0, %v2213_v3, %v1457_v24 }
 0x4da   :  { %v1507_v41 = vmax.f32 %v1465_v29, -1e+30  ;;  %v1464_v49 = vsel %vm1448_vm1, %v1409_v34, %v1456_v31  ;;  %v3528_v34 = vld [vmem:[#allocation28_spill] sm:$0xff] }
 0x4db   :  { %v1506_v2 = vmax.f32 %v1464_v49, -1e+30 }
 0x4dd   :  { %v1510_v61 = vmax.f32 %v1506_v2, %v1507_v41 }
 0x4de   :  { %v2216_v33 = vpop.f32.mrb[58].mxu0 }
 0x4df   :  { %vm1451_vm2 = vcmp.gt.f32.partialorder %v2216_v33, 0.0  ;;  %v1459_v15 = vmul.f32 0.01, %v2216_v33  ;;  %v1419_v8 = vpop.f32.mrb[59].mxu0 }
 0x4e0   :  { %vm1450_vm3 = vcmp.gt.f32.partialorder %v1419_v8, 0.0  ;;  %v1458_v53 = vmul.f32 0.01, %v1419_v8 }
 0x4e1   :  { %v1467_v20 = vsel %vm1451_vm2, %v2216_v33, %v1459_v15 }
 0x4e2   :  { %v1509_v43 = vmax.f32 %v1467_v20, -1e+30  ;;  %v1466_v18 = vsel %vm1450_vm3, %v1419_v8, %v1458_v53 }
 0x4e3   :  { %v1508_v60 = vmax.f32 %v1466_v18, -1e+30 }
 0x4e5   :  { %v1511_v11 = vmax.f32 %v1508_v60, %v1509_v43 }
 0x4e6   :  { %v2219_v48 = vpop.f32.mrb[60].mxu0 }
 0x4e7   :  { %v1512_v6 = vmax.f32 %v1510_v61, %v1511_v11  ;;  %v1429_v10 = vpop.f32.mrb[61].mxu0 }
 0x4e9   :  { %v1513_v19 = vrot.slane %v1512_v6, 4 }
 0x4eb   :  { %v1514_v27 = vmax.f32 %v1512_v6, %v1513_v19 }
 0x4ed   :  { %v1515_v16 = vrot.slane %v1514_v27, 2 }
 0x4ee   :  { %v2222_v28 = vpop.f32.mrb[62].mxu0 }
 0x4ef   :  { %v1439_v23 = vpop.f32.mrb[63].mxu0  ;;  %v1516_v38 = vmax.f32 %v1514_v27, %v1515_v16 }
 0x4f1   :  { %v1517_v52 = vrot.slane %v1516_v38, 1 }
 0x4f3   :  { %v1518_v57 = vmax.f32 %v1516_v38, %v1517_v52 }
 0x4f5   :  { %v1687_v32 = vmax.f32 %v1518_v57, %v1686_v25 }
 0x4f6   :  { %v2169_v0 = vpop.f32.mrb[48].mxu1 }
 0x4f7   :  { %v1303_v21 = vadd.f32 %v2169_v0, %v3521_v1  ;;  %v1263_v5 = vpop.f32.mrb[49].mxu1  ;;  %1688 = vst [vmem:[#allocation11] sm:$0x1] %v1687_v32 }
 0x4f8   :  { %v1302_v62 = vadd.f32 %v1263_v5, %v3522_v9 }
 0x4f9   :  { %v1311_v40 = vadd.f32 %v2727_v17, %v1303_v21 }
 0x4fa   :  { %v1310_v51 = vadd.f32 %v2727_v17, %v1302_v62  ;;  %v2172_v55 = vpop.f32.mrb[50].mxu1 }
 0x4fb   :  { %2711 = vtanh.f32 %v1311_v40  ;;  %v1305_v12 = vadd.f32 %v2172_v55, %v3523_v42  ;;  %v1273_v26 = vpop.f32.mrb[51].mxu1 }
 0x4fc   :  { %2713 = vtanh.f32 %v1310_v51  ;;  %v1304_v13 = vadd.f32 %v1273_v26, %v3524_v59 }
 0x4fd   :  { %v1313_v35 = vadd.f32 %v2727_v17, %v1305_v12 }
 0x4fe   :  { %v1312_v63 = vadd.f32 %v2727_v17, %v1304_v13  ;;  %v2175_v37 = vpop.f32.mrb[52].mxu1 }
 0x4ff   :  { %2715 = vtanh.f32 %v1313_v35  ;;  %v1307_v36 = vadd.f32 %v2175_v37, %v3525_v56  ;;  %v1283_v50 = vpop.f32.mrb[53].mxu1 }
 0x500   :  { %2717 = vtanh.f32 %v1312_v63  ;;  %v1306_v4 = vadd.f32 %v1283_v50, %v3526_v44 }
 0x501   :  { %v1315_v45 = vadd.f32 %v2727_v17, %v1307_v36 }
 0x502   :  { %v1314_v46 = vadd.f32 %v2727_v17, %v1306_v4  ;;  %v2178_v54 = vpop.f32.mrb[54].mxu1 }
 0x503   :  { %2719 = vtanh.f32 %v1315_v45  ;;  %v1309_v3 = vadd.f32 %v2178_v54, %v3527_v39  ;;  %v1293_v24 = vpop.f32.mrb[55].mxu1 }
 0x504   :  { %2721 = vtanh.f32 %v1314_v46  ;;  %v1308_v31 = vadd.f32 %v1293_v24, %v3528_v34 }
 0x505   :  { %v2712_v29 = vpop.eup %2711  ;;  %v1317_v41 = vadd.f32 %v2727_v17, %v1309_v3 }
 0x506   :  { %v2714_v49 = vpop.eup %2713  ;;  %1335 = vst [vmem:[#allocation10 + $0x48] sm:$0xff] %v2712_v29  ;;  %v1316_v2 = vadd.f32 %v2727_v17, %v1308_v31 }
 0x507   :  { %1334 = vst [vmem:[#allocation10 + $0x40] sm:$0xff] %v2714_v49  ;;  %2723 = vtanh.f32 %v1317_v41  ;;  %2255 = vmatprep.mubr.f32.mxu1 %v2714_v49 }
 0x508   :  { %2725 = vtanh.f32 %v1316_v2  ;;  %2256 = vmatmul.mubr.f32.vlgmr.msra.gmra.mrb[56].mxu1 %v2712_v29 }
 0x509   :  { %v2716_v61 = vpop.eup %2715 }
 0x50a   :  { %v2718_v22 = vpop.eup %2717  ;;  %1337 = vst [vmem:[#allocation10 + $0x58] sm:$0xff] %v2716_v61 }
 0x50b   :  { %1336 = vst [vmem:[#allocation10 + $0x50] sm:$0xff] %v2718_v22  ;;  %2258 = vmatprep.mubr.f32.mxu1 %v2718_v22 }
 0x50c   :  { %2259 = vmatmul.mubr.f32.gmra.mrb[58].mxu1 %v2716_v61 }
 0x50d   :  { %v2720_v58 = vpop.eup %2719 }
 0x50e   :  { %v2722_v33 = vpop.eup %2721  ;;  %1339 = vst [vmem:[#allocation10 + $0x68] sm:$0xff] %v2720_v58 }
 0x50f   :  { %1338 = vst [vmem:[#allocation10 + $0x60] sm:$0xff] %v2722_v33  ;;  %2261 = vmatprep.mubr.f32.mxu1 %v2722_v33 }
 0x510   :  { %2262 = vmatmul.mubr.f32.gmra.mrb[60].mxu1 %v2720_v58 }
 0x511   :  { %v2724_v15 = vpop.eup %2723 }
 0x512   :  { %v2726_v8 = vpop.eup %2725  ;;  %1341 = vst [vmem:[#allocation10 + $0x78] sm:$0xff] %v2724_v15 }
 0x513   :  { %1340 = vst [vmem:[#allocation10 + $0x70] sm:$0xff] %v2726_v8  ;;  %2264 = vmatprep.mubr.f32.mxu1 %v2726_v8 }
 0x514   :  { %2265 = vmatmul.mubr.f32.gmra.mrb[62].mxu1 %v2724_v15 }
 0x515   :  { %2827 = shalt.err (!%p2824_p8)
}
 0x516   :  { %s2828_s8 = scalar_lea.hbm %s3501_s5, 2048 }
 0x517   :  { %p2829_p9 = scmp.ne.s32.totalorder %s3501_s5, %s2828_s8  ;;  %p2832_p10 = scmp.lt.u32.totalorder %s2828_s8, %s3501_s5 }
 0x519   :  { %p2834_p11 = pnand %p2832_p10, %p2829_p9 }
 0x51b   :  { %2837 = shalt.err (!%p2834_p11)
}
 0x51c   :  { %1700 = dma.vmem_to_hbm [thread:$0]  %s1695_s26, 2048, %s3501_s5, [#allocation4], %s2874_s1, %s2874_s1, %s2875_s21  }
 0x51d   :  { %s2838_s14 = scalar_lea.vmem %s1708_s28, 16  ;;  %s2842_s15 = scalar_lea.vmem %s1708_s28, 32 }
 0x51e   :  { %p2839_p12 = scmp.ne.s32.totalorder %s1708_s28, %s2838_s14  ;;  %p2843_p13 = scmp.lt.s32.totalorder %s1708_s28, %s1708_s28 }
 0x51f   :  { %p2844_p0 = scmp.lt.s32.totalorder %s2842_s15, %s2838_s14 }
 0x521   :  { %p2845_p1 = por %p2844_p0, %p2843_p13 }
 0x523   :  { %p2846_p2 = pnand %p2845_p1, %p2839_p12 }
 0x525   :  { %2849 = shalt.err (!%p2846_p2)
}
 0x526   :  { %s2850_s18 = scalar_lea.hbm %s3502_s6, 16 }
 0x527   :  { %p2851_p3 = scmp.ne.s32.totalorder %s3502_s6, %s2850_s18  ;;  %p2854_p4 = scmp.lt.u32.totalorder %s2850_s18, %s3502_s6 }
 0x529   :  { %p2856_p5 = pnand %p2854_p4, %p2851_p3 }
 0x52b   :  { %2859 = shalt.err (!%p2856_p5)
}
 0x52c   :  { %1710 = dma.vmem_to_hbm [thread:$0]  %s1708_s28, 16, %s3502_s6, [#allocation12]  }
 0x5db   :  { %v2257_v53 = vpop.f32.mrb[56].mxu1 }
 0x5dc   :  { %v1586_v20 = vpop.f32.mrb[57].mxu1 }
 0x5df   :  { %v2260_v47 = vpop.f32.mrb[58].mxu1 }
 0x5e0   :  { %v1596_v43 = vpop.f32.mrb[59].mxu1 }
 0x5e3   :  { %v2263_v18 = vpop.f32.mrb[60].mxu1 }
 0x5e4   :  { %v1606_v60 = vpop.f32.mrb[61].mxu1 }
 0x5e7   :  { %v2266_v11 = vpop.f32.mrb[62].mxu1 }
 0x5e8   :  { %v1616_v7 = vpop.f32.mrb[63].mxu1 }
 0x5e9   :  { %2866 = dma.done.wait [#allocation4], 2048  }
 0x5ea   :  { %2867 = vsyncadd [#allocation4], 4294965248 }
 0x5eb   :  { %2868 = dma.done.wait [#allocation12], 16  }
 0x5ec   :  { %2869 = vsyncadd [#allocation12], 4294967280 }
 0x5ed   :  { %1717 = vsyncpa [#allocation3], 1 }
 0x5ee   :  { %1718 = vsyncpa [#allocation6], 1 }
 0x5ef   :  { %1719 = vsyncpa [#allocation9], 1 }
 0x5f0   :  { %1720 = vsyncpa [#allocation4], 1 }
 0x5f1   :  { %1721 = vsyncpa [#allocation12], 1 }

</bundles_post_ra>
